<compile_context>
chip_gen: v6e
topology: v6e:2x2x1
jax: 0.10.0
libtpu: 0.0.40
codegen_flags: <defaults>
</compile_context>

<pallas_src>
import jax
import jax.numpy as jnp
from jax.experimental import pallas as pl
from jax.experimental.pallas import tpu as pltpu

NUM_CLASSES = 19
CIN, C1, C2 = 3, 16, 32
_PAD = 8  # extra flat-layout slack so tap-shifted slices stay in bounds


# ------------------------------ fused kernel --------------------------------

def _make_kernel(*, th, wp, n_classes, c1, c2, l1, l2):
    """th: output rows per tile, wp: padded row stride (W+4),
    l1: flat length of the conv1 output grid (th+2 rows), l2: of conv2/head (th rows)."""

    def kernel(x1_ref, x2_ref, w1_ref, b1_ref, w2_ref, b2_ref, wo_ref,
               emask_ref, vmask_ref, o_ref):
        t = pl.program_id(1)
        nt = pl.num_programs(1)

        def conv3x3(x, w_ref, cout, lout):
            # x: (cin, Lin) bf16 in padded-flat layout; w_ref: (9, cout, cin) bf16.
            # tap (dh, dw) == 1-D shift by dh*wp + dw -> contiguous slice.
            acc = jnp.zeros((cout, lout), jnp.float32)
            for dh in range(3):
                for dw in range(3):
                    off = dh * wp + dw
                    acc = acc + jnp.dot(w_ref[dh * 3 + dw], x[:, off:off + lout],
                                        preferred_element_type=jnp.float32)
            return acc

        # Rows of the conv1 output grid that represent conv2's zero padding
        # (one extra row above / below the tile at the image boundary).
        pos1 = jax.lax.broadcasted_iota(jnp.int32, (1, l1), 1)
        pad_rows = ((t == 0) & (pos1 < wp)) | \
                   ((t == nt - 1) & (pos1 >= (th + 1) * wp))

        def seg_logits(x_ref):
            x = x_ref[0, 0]                                           # (CIN, L0) bf16
            h1 = jnp.maximum(conv3x3(x, w1_ref, c1, l1) + b1_ref[...], 0.0)
            # zero lateral padding / garbage columns + boundary pad rows
            h1 = jnp.where(pad_rows, 0.0, h1 * emask_ref[...])
            h1 = h1.astype(jnp.bfloat16)
            h2 = jnp.maximum(conv3x3(h1, w2_ref, c2, l2) + b2_ref[...], 0.0)
            h2 = h2.astype(jnp.bfloat16)
            return jnp.dot(wo_ref[...], h2,
                           preferred_element_type=jnp.float32)        # (NC, L2) f32

        logits1 = seg_logits(x1_ref)
        logits2 = seg_logits(x2_ref)

        # First-occurrence argmax over the leading (class) axis: sublane-only work.
        cls = jax.lax.broadcasted_iota(jnp.int32, (n_classes, l2), 0)

        def argmax_classes(l):
            m = jnp.max(l, axis=0, keepdims=True)
            cand = jnp.where(l == m, cls, n_classes)
            return jnp.min(cand, axis=0, keepdims=True)               # (1, L2) int32

        eq = (argmax_classes(logits1) == argmax_classes(logits2)).astype(jnp.float32)
        cnt = jnp.sum(eq * vmask_ref[...])                            # scalar

        @pl.when(t == 0)
        def _():
            o_ref[...] = jnp.zeros_like(o_ref)

        o_ref[...] = o_ref[...] + cnt                                 # accumulate over tiles

    return kernel


# ------------------------------ wrapper --------------------------------------

def _pick_tile_rows(H, tile_rows=None):
    t = min(H, 64 if tile_rows is None else tile_rows)
    while H % t:
        t -= 1
    return t


def semantic_consistency_loss(params, x1_nchw, x2_nchw, tile_rows=None):
    """loss[b] = (#pixels where argmax_c seg(x1) == argmax_c seg(x2)) / (H*W)."""
    B, Cin, H, W = x1_nchw.shape
    th = _pick_tile_rows(H, tile_rows)
    nt = H // th
    Wp = W + 4
    L0 = (th + 4) * Wp + 2 * _PAD   # flat input tile length (2-row halo each side)
    L1 = (th + 2) * Wp + _PAD       # conv1 output grid (1 halo row each side)
    L2 = th * Wp                    # conv2 / head output grid

    def prep(x):
        # zero-pad by 2 (two stacked 3x3 convs), pre-tile rows with halo, flatten.
        xp = jnp.pad(x.astype(jnp.float32), ((0, 0), (0, 0), (2, 2), (2, 2)))
        tiles = jnp.stack([xp[:, :, t * th: t * th + th + 4, :] for t in range(nt)],
                          axis=1)                                     # (B, nt, C, th+4, Wp)
        flat = tiles.reshape(B, nt, Cin, (th + 4) * Wp)
        flat = jnp.pad(flat, ((0, 0), (0, 0), (0, 0), (0, L0 - (th + 4) * Wp)))
        return flat.astype(jnp.bfloat16)

    x1t = prep(x1_nchw)
    x2t = prep(x2_nchw)

    # Fold eval-mode BatchNorm scale into the conv weights, reorder to (tap, out, in).
    def fold(w, scale):
        w = w * scale[:, None, None, None]
        return jnp.transpose(w, (2, 3, 0, 1)).reshape(9, w.shape[0], w.shape[1]) \
                  .astype(jnp.bfloat16)

    w1t = fold(params["w1"], params["scale1"])
    w2t = fold(params["w2"], params["scale2"])
    wot = params["w_out"].astype(jnp.bfloat16)
    b1 = params["bias1"].reshape(C1, 1).astype(jnp.float32)
    b2 = params["bias2"].reshape(C2, 1).astype(jnp.float32)

    # Static masks (flat layout): conv1-grid lateral padding/garbage columns,
    # and valid (non-garbage) columns of the output grid.
    p1 = jnp.arange(L1, dtype=jnp.int32)
    c1col = p1 % Wp
    emask = (((c1col >= 1) & (c1col <= W) & (p1 < (th + 2) * Wp))
             .astype(jnp.float32)[None, :])
    q = jnp.arange(L2, dtype=jnp.int32)
    vmask = ((q % Wp) < W).astype(jnp.float32)[None, :]

    kernel = _make_kernel(th=th, wp=Wp, n_classes=NUM_CLASSES, c1=C1, c2=C2,
                          l1=L1, l2=L2)

    counts = pl.pallas_call(
        kernel,
        out_shape=jax.ShapeDtypeStruct((B, 1, 128), jnp.float32),
        grid=(B, nt),
        in_specs=[
            pl.BlockSpec((1, 1, Cin, L0), lambda b, t: (b, t, 0, 0)),   # x1 tiles
            pl.BlockSpec((1, 1, Cin, L0), lambda b, t: (b, t, 0, 0)),   # x2 tiles
            pl.BlockSpec((9, C1, Cin), lambda b, t: (0, 0, 0)),         # w1 (taps, out, in)
            pl.BlockSpec((C1, 1), lambda b, t: (0, 0)),                 # bn1 bias
            pl.BlockSpec((9, C2, C1), lambda b, t: (0, 0, 0)),          # w2
            pl.BlockSpec((C2, 1), lambda b, t: (0, 0)),                 # bn2 bias
            pl.BlockSpec((NUM_CLASSES, C2), lambda b, t: (0, 0)),       # 1x1 head
            pl.BlockSpec((1, L1), lambda b, t: (0, 0)),                 # edge mask
            pl.BlockSpec((1, L2), lambda b, t: (0, 0)),                 # valid mask
        ],
        out_specs=pl.BlockSpec((1, 1, 128), lambda b, t: (b, 0, 0)),
        compiler_params=pltpu.CompilerParams(
            dimension_semantics=("parallel", "arbitrary"),
            vmem_limit_bytes=64 * 1024 * 1024),
    )(x1t, x2t, w1t, b1, w2t, b2, wot, emask, vmask)

    return counts[:, 0, 0] / float(H * W)


# ------------------------------ params / reference ---------------------------

def init_params(key):
    k1, k2, k3 = jax.random.split(key, 3)

    def kaiming(k, shape):  # kaiming_normal_(a=1): std = 1/sqrt(fan_in)
        fan_in = shape[1] * shape[2] * shape[3]
        return jax.random.normal(k, shape, jnp.float32) / jnp.sqrt(jnp.float32(fan_in))

    eps = 1e-5
    bn_scale = (1.0 + eps) ** -0.5  # eval-mode BN: gamma=1, beta=0, mean=0, var=1
    return {
        "w1": kaiming(k1, (C1, CIN, 3, 3)),
        "w2": kaiming(k2, (C2, C1, 3, 3)),
        "w_out": jax.random.normal(k3, (NUM_CLASSES, C2), jnp.float32)
                 / jnp.sqrt(jnp.float32(C2)),
        "scale1": jnp.full((C1,), bn_scale, jnp.float32),
        "bias1": jnp.zeros((C1,), jnp.float32),
        "scale2": jnp.full((C2,), bn_scale, jnp.float32),
        "bias2": jnp.zeros((C2,), jnp.float32),
    }


def reference_loss(params, x1, x2):
    """Plain-JAX reference with the same bf16/f32 recipe as the kernel."""
    dn = ("NCHW", "OIHW", "NCHW")
    c1w = (params["w1"] * params["scale1"][:, None, None, None]).astype(jnp.bfloat16)
    c2w = (params["w2"] * params["scale2"][:, None, None, None]).astype(jnp.bfloat16)
    wow = params["w_out"].astype(jnp.bfloat16)

    def seg(x):
        h = jax.lax.conv_general_dilated(x.astype(jnp.bfloat16), c1w, (1, 1), "SAME",
                                         dimension_numbers=dn,
                                         preferred_element_type=jnp.float32)
        h = jnp.maximum(h + params["bias1"][None, :, None, None], 0.0).astype(jnp.bfloat16)
        h = jax.lax.conv_general_dilated(h, c2w, (1, 1), "SAME", dimension_numbers=dn,
                                         preferred_element_type=jnp.float32)
        h = jnp.maximum(h + params["bias2"][None, :, None, None], 0.0).astype(jnp.bfloat16)
        return jnp.einsum("oc,bchw->bohw", wow, h,
                          preferred_element_type=jnp.float32)

    a1 = jnp.argmax(seg(x1), axis=1)
    a2 = jnp.argmax(seg(x2), axis=1)
    return jnp.mean((a1 == a2).astype(jnp.float32), axis=(1, 2))


# ----------------------------------- main ------------------------------------

if __name__ == "__main__":
    key = jax.random.PRNGKey(0)
    kp, kx1, kx2 = jax.random.split(key, 3)
    params = init_params(kp)

    B, C, H, W = 2, 3, 16, 16
    x1 = jax.random.normal(kx1, (B, C, H, W), jnp.float32)
    x2 = x1 + 0.1 * jax.random.normal(kx2, (B, C, H, W), jnp.float32)

    loss_fn = jax.jit(lambda p, a, b: semantic_consistency_loss(p, a, b, tile_rows=8))

    loss = jax.block_until_ready(loss_fn(params, x1, x2))
    assert loss.shape == (B,)
    assert bool(jnp.all((loss >= 0.0) & (loss <= 1.0)))

    # identical inputs must agree on every pixel (exact)
    loss_same = jax.block_until_ready(loss_fn(params, x1, x1))
    assert bool(jnp.all(loss_same == 1.0))

    # cross-check against the plain-JAX reference (same precision recipe)
    ref = jax.block_until_ready(jax.jit(reference_loss)(params, x1, x2))
    assert float(jnp.max(jnp.abs(loss - ref))) <= 0.05

    print("KERNEL_OK")
</pallas_src>

<mosaic_0001>
module attributes {stable_mosaic.version = 11 : i64} {
  func.func @kernel(%arg0: i32, %arg1: i32, %arg2: memref<1x1x3x256xbf16, #tpu.memory_space<vmem>>, %arg3: memref<1x1x3x256xbf16, #tpu.memory_space<vmem>>, %arg4: memref<9x16x3xbf16, #tpu.memory_space<vmem>>, %arg5: memref<16x1xf32, #tpu.memory_space<vmem>>, %arg6: memref<9x32x16xbf16, #tpu.memory_space<vmem>>, %arg7: memref<32x1xf32, #tpu.memory_space<vmem>>, %arg8: memref<19x32xbf16, #tpu.memory_space<vmem>>, %arg9: memref<1x208xf32, #tpu.memory_space<vmem>>, %arg10: memref<1x160xf32, #tpu.memory_space<vmem>>, %arg11: memref<1x1x128xf32, #tpu.memory_space<vmem>>) attributes {dimension_semantics = [#tpu.dimension_semantics<parallel>, #tpu.dimension_semantics<arbitrary>], iteration_bounds = array<i64: 2, 2>, scalar_prefetch = 0 : i64, scratch_operands = 0 : i64, tpu.core_type = #tpu.core_type<tc>, window_params = [{transform_indices = @transform_0, window_bounds = array<i64: 1, 1, 3, 256>}, {transform_indices = @transform_1, window_bounds = array<i64: 1, 1, 3, 256>}, {pipeline_mode = #tpu.pipeline_mode<synchronous>, transform_indices = @transform_2, window_bounds = array<i64: 9, 16, 3>}, {pipeline_mode = #tpu.pipeline_mode<synchronous>, transform_indices = @transform_3, window_bounds = array<i64: 16, 1>}, {pipeline_mode = #tpu.pipeline_mode<synchronous>, transform_indices = @transform_4, window_bounds = array<i64: 9, 32, 16>}, {pipeline_mode = #tpu.pipeline_mode<synchronous>, transform_indices = @transform_5, window_bounds = array<i64: 32, 1>}, {pipeline_mode = #tpu.pipeline_mode<synchronous>, transform_indices = @transform_6, window_bounds = array<i64: 19, 32>}, {pipeline_mode = #tpu.pipeline_mode<synchronous>, transform_indices = @transform_7, window_bounds = array<i64: 1, 208>}, {pipeline_mode = #tpu.pipeline_mode<synchronous>, transform_indices = @transform_8, window_bounds = array<i64: 1, 160>}, {transform_indices = @transform_9, window_bounds = array<i64: 1, 1, 128>}]} {
    %0 = tpu.iota {dimensions = array<i32: 1>} : vector<1x208xi32>
    %c0_i32 = arith.constant 0 : i32
    %1 = arith.cmpi eq, %arg1, %c0_i32 : i32
    %c20_i32 = arith.constant 20 : i32
    %2 = vector.broadcast %c20_i32 : i32 to vector<1x208xi32>
    %3 = arith.cmpi slt, %0, %2 : vector<1x208xi32>
    %4 = vector.broadcast %1 : i1 to vector<1x208xi1>
    %5 = arith.andi %4, %3 : vector<1x208xi1>
    %c1_i32 = arith.constant 1 : i32
    %6 = arith.cmpi eq, %arg1, %c1_i32 : i32
    %c180_i32 = arith.constant 180 : i32
    %7 = vector.broadcast %c180_i32 : i32 to vector<1x208xi32>
    %8 = arith.cmpi sge, %0, %7 : vector<1x208xi32>
    %9 = vector.broadcast %6 : i1 to vector<1x208xi1>
    %10 = arith.andi %9, %8 : vector<1x208xi1>
    %11 = arith.ori %5, %10 : vector<1x208xi1>
    %c0 = arith.constant 0 : index
    %c0_0 = arith.constant 0 : index
    %c0_1 = arith.constant 0 : index
    %c0_2 = arith.constant 0 : index
    %12 = vector.load %arg2[%c0, %c0_0, %c0_1, %c0_2] : memref<1x1x3x256xbf16, #tpu.memory_space<vmem>>, vector<1x1x3x256xbf16>
    %13 = vector.shape_cast %12 : vector<1x1x3x256xbf16> to vector<3x256xbf16>
    %cst = arith.constant 0.000000e+00 : f32
    %14 = vector.broadcast %cst : f32 to vector<16x208xf32>
    %c0_3 = arith.constant 0 : index
    %c0_4 = arith.constant 0 : index
    %c0_5 = arith.constant 0 : index
    %15 = vector.load %arg4[%c0_3, %c0_4, %c0_5] : memref<9x16x3xbf16, #tpu.memory_space<vmem>>, vector<1x16x3xbf16>
    %16 = vector.shape_cast %15 : vector<1x16x3xbf16> to vector<16x3xbf16>
    %17 = vector.extract_strided_slice %13 {offsets = [0, 0], sizes = [3, 208], strides = [1, 1]} : vector<3x256xbf16> to vector<3x208xbf16>
    %cst_6 = arith.constant dense<0.000000e+00> : vector<16x208xf32>
    %18 = tpu.matmul %16, %17, %cst_6 {dimension_numbers = #tpu.dot_dimension_numbers<[1], [0], [0], [1], [0, 0, 1, 1], [], []>} : vector<16x3xbf16>, vector<3x208xbf16>, vector<16x208xf32> -> vector<16x208xf32>
    %19 = arith.addf %14, %18 : vector<16x208xf32>
    %c1 = arith.constant 1 : index
    %c0_7 = arith.constant 0 : index
    %c0_8 = arith.constant 0 : index
    %20 = vector.load %arg4[%c1, %c0_7, %c0_8] : memref<9x16x3xbf16, #tpu.memory_space<vmem>>, vector<1x16x3xbf16>
    %21 = vector.shape_cast %20 : vector<1x16x3xbf16> to vector<16x3xbf16>
    %22 = vector.extract_strided_slice %13 {offsets = [0, 1], sizes = [3, 208], strides = [1, 1]} : vector<3x256xbf16> to vector<3x208xbf16>
    %cst_9 = arith.constant dense<0.000000e+00> : vector<16x208xf32>
    %23 = tpu.matmul %21, %22, %cst_9 {dimension_numbers = #tpu.dot_dimension_numbers<[1], [0], [0], [1], [0, 0, 1, 1], [], []>} : vector<16x3xbf16>, vector<3x208xbf16>, vector<16x208xf32> -> vector<16x208xf32>
    %24 = arith.addf %19, %23 : vector<16x208xf32>
    %c2 = arith.constant 2 : index
    %c0_10 = arith.constant 0 : index
    %c0_11 = arith.constant 0 : index
    %25 = vector.load %arg4[%c2, %c0_10, %c0_11] : memref<9x16x3xbf16, #tpu.memory_space<vmem>>, vector<1x16x3xbf16>
    %26 = vector.shape_cast %25 : vector<1x16x3xbf16> to vector<16x3xbf16>
    %27 = vector.extract_strided_slice %13 {offsets = [0, 2], sizes = [3, 208], strides = [1, 1]} : vector<3x256xbf16> to vector<3x208xbf16>
    %cst_12 = arith.constant dense<0.000000e+00> : vector<16x208xf32>
    %28 = tpu.matmul %26, %27, %cst_12 {dimension_numbers = #tpu.dot_dimension_numbers<[1], [0], [0], [1], [0, 0, 1, 1], [], []>} : vector<16x3xbf16>, vector<3x208xbf16>, vector<16x208xf32> -> vector<16x208xf32>
    %29 = arith.addf %24, %28 : vector<16x208xf32>
    %c3 = arith.constant 3 : index
    %c0_13 = arith.constant 0 : index
    %c0_14 = arith.constant 0 : index
    %30 = vector.load %arg4[%c3, %c0_13, %c0_14] : memref<9x16x3xbf16, #tpu.memory_space<vmem>>, vector<1x16x3xbf16>
    %31 = vector.shape_cast %30 : vector<1x16x3xbf16> to vector<16x3xbf16>
    %32 = vector.extract_strided_slice %13 {offsets = [0, 20], sizes = [3, 208], strides = [1, 1]} : vector<3x256xbf16> to vector<3x208xbf16>
    %cst_15 = arith.constant dense<0.000000e+00> : vector<16x208xf32>
    %33 = tpu.matmul %31, %32, %cst_15 {dimension_numbers = #tpu.dot_dimension_numbers<[1], [0], [0], [1], [0, 0, 1, 1], [], []>} : vector<16x3xbf16>, vector<3x208xbf16>, vector<16x208xf32> -> vector<16x208xf32>
    %34 = arith.addf %29, %33 : vector<16x208xf32>
    %c4 = arith.constant 4 : index
    %c0_16 = arith.constant 0 : index
    %c0_17 = arith.constant 0 : index
    %35 = vector.load %arg4[%c4, %c0_16, %c0_17] : memref<9x16x3xbf16, #tpu.memory_space<vmem>>, vector<1x16x3xbf16>
    %36 = vector.shape_cast %35 : vector<1x16x3xbf16> to vector<16x3xbf16>
    %37 = vector.extract_strided_slice %13 {offsets = [0, 21], sizes = [3, 208], strides = [1, 1]} : vector<3x256xbf16> to vector<3x208xbf16>
    %cst_18 = arith.constant dense<0.000000e+00> : vector<16x208xf32>
    %38 = tpu.matmul %36, %37, %cst_18 {dimension_numbers = #tpu.dot_dimension_numbers<[1], [0], [0], [1], [0, 0, 1, 1], [], []>} : vector<16x3xbf16>, vector<3x208xbf16>, vector<16x208xf32> -> vector<16x208xf32>
    %39 = arith.addf %34, %38 : vector<16x208xf32>
    %c5 = arith.constant 5 : index
    %c0_19 = arith.constant 0 : index
    %c0_20 = arith.constant 0 : index
    %40 = vector.load %arg4[%c5, %c0_19, %c0_20] : memref<9x16x3xbf16, #tpu.memory_space<vmem>>, vector<1x16x3xbf16>
    %41 = vector.shape_cast %40 : vector<1x16x3xbf16> to vector<16x3xbf16>
    %42 = vector.extract_strided_slice %13 {offsets = [0, 22], sizes = [3, 208], strides = [1, 1]} : vector<3x256xbf16> to vector<3x208xbf16>
    %cst_21 = arith.constant dense<0.000000e+00> : vector<16x208xf32>
    %43 = tpu.matmul %41, %42, %cst_21 {dimension_numbers = #tpu.dot_dimension_numbers<[1], [0], [0], [1], [0, 0, 1, 1], [], []>} : vector<16x3xbf16>, vector<3x208xbf16>, vector<16x208xf32> -> vector<16x208xf32>
    %44 = arith.addf %39, %43 : vector<16x208xf32>
    %c6 = arith.constant 6 : index
    %c0_22 = arith.constant 0 : index
    %c0_23 = arith.constant 0 : index
    %45 = vector.load %arg4[%c6, %c0_22, %c0_23] : memref<9x16x3xbf16, #tpu.memory_space<vmem>>, vector<1x16x3xbf16>
    %46 = vector.shape_cast %45 : vector<1x16x3xbf16> to vector<16x3xbf16>
    %47 = vector.extract_strided_slice %13 {offsets = [0, 40], sizes = [3, 208], strides = [1, 1]} : vector<3x256xbf16> to vector<3x208xbf16>
    %cst_24 = arith.constant dense<0.000000e+00> : vector<16x208xf32>
    %48 = tpu.matmul %46, %47, %cst_24 {dimension_numbers = #tpu.dot_dimension_numbers<[1], [0], [0], [1], [0, 0, 1, 1], [], []>} : vector<16x3xbf16>, vector<3x208xbf16>, vector<16x208xf32> -> vector<16x208xf32>
    %49 = arith.addf %44, %48 : vector<16x208xf32>
    %c7 = arith.constant 7 : index
    %c0_25 = arith.constant 0 : index
    %c0_26 = arith.constant 0 : index
    %50 = vector.load %arg4[%c7, %c0_25, %c0_26] : memref<9x16x3xbf16, #tpu.memory_space<vmem>>, vector<1x16x3xbf16>
    %51 = vector.shape_cast %50 : vector<1x16x3xbf16> to vector<16x3xbf16>
    %52 = vector.extract_strided_slice %13 {offsets = [0, 41], sizes = [3, 208], strides = [1, 1]} : vector<3x256xbf16> to vector<3x208xbf16>
    %cst_27 = arith.constant dense<0.000000e+00> : vector<16x208xf32>
    %53 = tpu.matmul %51, %52, %cst_27 {dimension_numbers = #tpu.dot_dimension_numbers<[1], [0], [0], [1], [0, 0, 1, 1], [], []>} : vector<16x3xbf16>, vector<3x208xbf16>, vector<16x208xf32> -> vector<16x208xf32>
    %54 = arith.addf %49, %53 : vector<16x208xf32>
    %c8 = arith.constant 8 : index
    %c0_28 = arith.constant 0 : index
    %c0_29 = arith.constant 0 : index
    %55 = vector.load %arg4[%c8, %c0_28, %c0_29] : memref<9x16x3xbf16, #tpu.memory_space<vmem>>, vector<1x16x3xbf16>
    %56 = vector.shape_cast %55 : vector<1x16x3xbf16> to vector<16x3xbf16>
    %57 = vector.extract_strided_slice %13 {offsets = [0, 42], sizes = [3, 208], strides = [1, 1]} : vector<3x256xbf16> to vector<3x208xbf16>
    %cst_30 = arith.constant dense<0.000000e+00> : vector<16x208xf32>
    %58 = tpu.matmul %56, %57, %cst_30 {dimension_numbers = #tpu.dot_dimension_numbers<[1], [0], [0], [1], [0, 0, 1, 1], [], []>} : vector<16x3xbf16>, vector<3x208xbf16>, vector<16x208xf32> -> vector<16x208xf32>
    %59 = arith.addf %54, %58 : vector<16x208xf32>
    %c0_31 = arith.constant 0 : index
    %c0_32 = arith.constant 0 : index
    %60 = vector.load %arg5[%c0_31, %c0_32] : memref<16x1xf32, #tpu.memory_space<vmem>>, vector<16x1xf32>
    %61 = vector.broadcast %60 : vector<16x1xf32> to vector<16x208xf32>
    %62 = arith.addf %59, %61 : vector<16x208xf32>
    %cst_33 = arith.constant 0.000000e+00 : f32
    %63 = vector.broadcast %cst_33 : f32 to vector<16x208xf32>
    %64 = arith.maximumf %62, %63 : vector<16x208xf32>
    %c0_34 = arith.constant 0 : index
    %c0_35 = arith.constant 0 : index
    %65 = vector.load %arg9[%c0_34, %c0_35] : memref<1x208xf32, #tpu.memory_space<vmem>>, vector<1x208xf32>
    %66 = vector.broadcast %65 : vector<1x208xf32> to vector<16x208xf32>
    %67 = arith.mulf %64, %66 : vector<16x208xf32>
    %cst_36 = arith.constant 0.000000e+00 : f32
    %68 = vector.shape_cast %11 : vector<1x208xi1> to vector<1x208xi1>
    %69 = vector.broadcast %68 : vector<1x208xi1> to vector<16x208xi1>
    %70 = vector.broadcast %cst_36 : f32 to vector<16x208xf32>
    %71 = arith.select %69, %70, %67 : vector<16x208xi1>, vector<16x208xf32>
    %72 = arith.truncf %71 : vector<16x208xf32> to vector<16x208xbf16>
    %cst_37 = arith.constant 0.000000e+00 : f32
    %73 = vector.broadcast %cst_37 : f32 to vector<32x160xf32>
    %c0_38 = arith.constant 0 : index
    %c0_39 = arith.constant 0 : index
    %c0_40 = arith.constant 0 : index
    %74 = vector.load %arg6[%c0_38, %c0_39, %c0_40] : memref<9x32x16xbf16, #tpu.memory_space<vmem>>, vector<1x32x16xbf16>
    %75 = vector.shape_cast %74 : vector<1x32x16xbf16> to vector<32x16xbf16>
    %76 = vector.extract_strided_slice %72 {offsets = [0, 0], sizes = [16, 160], strides = [1, 1]} : vector<16x208xbf16> to vector<16x160xbf16>
    %cst_41 = arith.constant dense<0.000000e+00> : vector<32x160xf32>
    %77 = tpu.matmul %75, %76, %cst_41 {dimension_numbers = #tpu.dot_dimension_numbers<[1], [0], [0], [1], [0, 0, 1, 1], [], []>} : vector<32x16xbf16>, vector<16x160xbf16>, vector<32x160xf32> -> vector<32x160xf32>
    %78 = arith.addf %73, %77 : vector<32x160xf32>
    %c1_42 = arith.constant 1 : index
    %c0_43 = arith.constant 0 : index
    %c0_44 = arith.constant 0 : index
    %79 = vector.load %arg6[%c1_42, %c0_43, %c0_44] : memref<9x32x16xbf16, #tpu.memory_space<vmem>>, vector<1x32x16xbf16>
    %80 = vector.shape_cast %79 : vector<1x32x16xbf16> to vector<32x16xbf16>
    %81 = vector.extract_strided_slice %72 {offsets = [0, 1], sizes = [16, 160], strides = [1, 1]} : vector<16x208xbf16> to vector<16x160xbf16>
    %cst_45 = arith.constant dense<0.000000e+00> : vector<32x160xf32>
    %82 = tpu.matmul %80, %81, %cst_45 {dimension_numbers = #tpu.dot_dimension_numbers<[1], [0], [0], [1], [0, 0, 1, 1], [], []>} : vector<32x16xbf16>, vector<16x160xbf16>, vector<32x160xf32> -> vector<32x160xf32>
    %83 = arith.addf %78, %82 : vector<32x160xf32>
    %c2_46 = arith.constant 2 : index
    %c0_47 = arith.constant 0 : index
    %c0_48 = arith.constant 0 : index
    %84 = vector.load %arg6[%c2_46, %c0_47, %c0_48] : memref<9x32x16xbf16, #tpu.memory_space<vmem>>, vector<1x32x16xbf16>
    %85 = vector.shape_cast %84 : vector<1x32x16xbf16> to vector<32x16xbf16>
    %86 = vector.extract_strided_slice %72 {offsets = [0, 2], sizes = [16, 160], strides = [1, 1]} : vector<16x208xbf16> to vector<16x160xbf16>
    %cst_49 = arith.constant dense<0.000000e+00> : vector<32x160xf32>
    %87 = tpu.matmul %85, %86, %cst_49 {dimension_numbers = #tpu.dot_dimension_numbers<[1], [0], [0], [1], [0, 0, 1, 1], [], []>} : vector<32x16xbf16>, vector<16x160xbf16>, vector<32x160xf32> -> vector<32x160xf32>
    %88 = arith.addf %83, %87 : vector<32x160xf32>
    %c3_50 = arith.constant 3 : index
    %c0_51 = arith.constant 0 : index
    %c0_52 = arith.constant 0 : index
    %89 = vector.load %arg6[%c3_50, %c0_51, %c0_52] : memref<9x32x16xbf16, #tpu.memory_space<vmem>>, vector<1x32x16xbf16>
    %90 = vector.shape_cast %89 : vector<1x32x16xbf16> to vector<32x16xbf16>
    %91 = vector.extract_strided_slice %72 {offsets = [0, 20], sizes = [16, 160], strides = [1, 1]} : vector<16x208xbf16> to vector<16x160xbf16>
    %cst_53 = arith.constant dense<0.000000e+00> : vector<32x160xf32>
    %92 = tpu.matmul %90, %91, %cst_53 {dimension_numbers = #tpu.dot_dimension_numbers<[1], [0], [0], [1], [0, 0, 1, 1], [], []>} : vector<32x16xbf16>, vector<16x160xbf16>, vector<32x160xf32> -> vector<32x160xf32>
    %93 = arith.addf %88, %92 : vector<32x160xf32>
    %c4_54 = arith.constant 4 : index
    %c0_55 = arith.constant 0 : index
    %c0_56 = arith.constant 0 : index
    %94 = vector.load %arg6[%c4_54, %c0_55, %c0_56] : memref<9x32x16xbf16, #tpu.memory_space<vmem>>, vector<1x32x16xbf16>
    %95 = vector.shape_cast %94 : vector<1x32x16xbf16> to vector<32x16xbf16>
    %96 = vector.extract_strided_slice %72 {offsets = [0, 21], sizes = [16, 160], strides = [1, 1]} : vector<16x208xbf16> to vector<16x160xbf16>
    %cst_57 = arith.constant dense<0.000000e+00> : vector<32x160xf32>
    %97 = tpu.matmul %95, %96, %cst_57 {dimension_numbers = #tpu.dot_dimension_numbers<[1], [0], [0], [1], [0, 0, 1, 1], [], []>} : vector<32x16xbf16>, vector<16x160xbf16>, vector<32x160xf32> -> vector<32x160xf32>
    %98 = arith.addf %93, %97 : vector<32x160xf32>
    %c5_58 = arith.constant 5 : index
    %c0_59 = arith.constant 0 : index
    %c0_60 = arith.constant 0 : index
    %99 = vector.load %arg6[%c5_58, %c0_59, %c0_60] : memref<9x32x16xbf16, #tpu.memory_space<vmem>>, vector<1x32x16xbf16>
    %100 = vector.shape_cast %99 : vector<1x32x16xbf16> to vector<32x16xbf16>
    %101 = vector.extract_strided_slice %72 {offsets = [0, 22], sizes = [16, 160], strides = [1, 1]} : vector<16x208xbf16> to vector<16x160xbf16>
    %cst_61 = arith.constant dense<0.000000e+00> : vector<32x160xf32>
    %102 = tpu.matmul %100, %101, %cst_61 {dimension_numbers = #tpu.dot_dimension_numbers<[1], [0], [0], [1], [0, 0, 1, 1], [], []>} : vector<32x16xbf16>, vector<16x160xbf16>, vector<32x160xf32> -> vector<32x160xf32>
    %103 = arith.addf %98, %102 : vector<32x160xf32>
    %c6_62 = arith.constant 6 : index
    %c0_63 = arith.constant 0 : index
    %c0_64 = arith.constant 0 : index
    %104 = vector.load %arg6[%c6_62, %c0_63, %c0_64] : memref<9x32x16xbf16, #tpu.memory_space<vmem>>, vector<1x32x16xbf16>
    %105 = vector.shape_cast %104 : vector<1x32x16xbf16> to vector<32x16xbf16>
    %106 = vector.extract_strided_slice %72 {offsets = [0, 40], sizes = [16, 160], strides = [1, 1]} : vector<16x208xbf16> to vector<16x160xbf16>
    %cst_65 = arith.constant dense<0.000000e+00> : vector<32x160xf32>
    %107 = tpu.matmul %105, %106, %cst_65 {dimension_numbers = #tpu.dot_dimension_numbers<[1], [0], [0], [1], [0, 0, 1, 1], [], []>} : vector<32x16xbf16>, vector<16x160xbf16>, vector<32x160xf32> -> vector<32x160xf32>
    %108 = arith.addf %103, %107 : vector<32x160xf32>
    %c7_66 = arith.constant 7 : index
    %c0_67 = arith.constant 0 : index
    %c0_68 = arith.constant 0 : index
    %109 = vector.load %arg6[%c7_66, %c0_67, %c0_68] : memref<9x32x16xbf16, #tpu.memory_space<vmem>>, vector<1x32x16xbf16>
    %110 = vector.shape_cast %109 : vector<1x32x16xbf16> to vector<32x16xbf16>
    %111 = vector.extract_strided_slice %72 {offsets = [0, 41], sizes = [16, 160], strides = [1, 1]} : vector<16x208xbf16> to vector<16x160xbf16>
    %cst_69 = arith.constant dense<0.000000e+00> : vector<32x160xf32>
    %112 = tpu.matmul %110, %111, %cst_69 {dimension_numbers = #tpu.dot_dimension_numbers<[1], [0], [0], [1], [0, 0, 1, 1], [], []>} : vector<32x16xbf16>, vector<16x160xbf16>, vector<32x160xf32> -> vector<32x160xf32>
    %113 = arith.addf %108, %112 : vector<32x160xf32>
    %c8_70 = arith.constant 8 : index
    %c0_71 = arith.constant 0 : index
    %c0_72 = arith.constant 0 : index
    %114 = vector.load %arg6[%c8_70, %c0_71, %c0_72] : memref<9x32x16xbf16, #tpu.memory_space<vmem>>, vector<1x32x16xbf16>
    %115 = vector.shape_cast %114 : vector<1x32x16xbf16> to vector<32x16xbf16>
    %116 = vector.extract_strided_slice %72 {offsets = [0, 42], sizes = [16, 160], strides = [1, 1]} : vector<16x208xbf16> to vector<16x160xbf16>
    %cst_73 = arith.constant dense<0.000000e+00> : vector<32x160xf32>
    %117 = tpu.matmul %115, %116, %cst_73 {dimension_numbers = #tpu.dot_dimension_numbers<[1], [0], [0], [1], [0, 0, 1, 1], [], []>} : vector<32x16xbf16>, vector<16x160xbf16>, vector<32x160xf32> -> vector<32x160xf32>
    %118 = arith.addf %113, %117 : vector<32x160xf32>
    %c0_74 = arith.constant 0 : index
    %c0_75 = arith.constant 0 : index
    %119 = vector.load %arg7[%c0_74, %c0_75] : memref<32x1xf32, #tpu.memory_space<vmem>>, vector<32x1xf32>
    %120 = vector.broadcast %119 : vector<32x1xf32> to vector<32x160xf32>
    %121 = arith.addf %118, %120 : vector<32x160xf32>
    %cst_76 = arith.constant 0.000000e+00 : f32
    %122 = vector.broadcast %cst_76 : f32 to vector<32x160xf32>
    %123 = arith.maximumf %121, %122 : vector<32x160xf32>
    %124 = arith.truncf %123 : vector<32x160xf32> to vector<32x160xbf16>
    %c0_77 = arith.constant 0 : index
    %c0_78 = arith.constant 0 : index
    %125 = vector.load %arg8[%c0_77, %c0_78] : memref<19x32xbf16, #tpu.memory_space<vmem>>, vector<19x32xbf16>
    %cst_79 = arith.constant dense<0.000000e+00> : vector<19x160xf32>
    %126 = tpu.matmul %125, %124, %cst_79 {dimension_numbers = #tpu.dot_dimension_numbers<[1], [0], [0], [1], [0, 0, 1, 1], [], []>} : vector<19x32xbf16>, vector<32x160xbf16>, vector<19x160xf32> -> vector<19x160xf32>
    %c0_80 = arith.constant 0 : index
    %c0_81 = arith.constant 0 : index
    %c0_82 = arith.constant 0 : index
    %c0_83 = arith.constant 0 : index
    %127 = vector.load %arg3[%c0_80, %c0_81, %c0_82, %c0_83] : memref<1x1x3x256xbf16, #tpu.memory_space<vmem>>, vector<1x1x3x256xbf16>
    %128 = vector.shape_cast %127 : vector<1x1x3x256xbf16> to vector<3x256xbf16>
    %cst_84 = arith.constant 0.000000e+00 : f32
    %129 = vector.broadcast %cst_84 : f32 to vector<16x208xf32>
    %c0_85 = arith.constant 0 : index
    %c0_86 = arith.constant 0 : index
    %c0_87 = arith.constant 0 : index
    %130 = vector.load %arg4[%c0_85, %c0_86, %c0_87] : memref<9x16x3xbf16, #tpu.memory_space<vmem>>, vector<1x16x3xbf16>
    %131 = vector.shape_cast %130 : vector<1x16x3xbf16> to vector<16x3xbf16>
    %132 = vector.extract_strided_slice %128 {offsets = [0, 0], sizes = [3, 208], strides = [1, 1]} : vector<3x256xbf16> to vector<3x208xbf16>
    %cst_88 = arith.constant dense<0.000000e+00> : vector<16x208xf32>
    %133 = tpu.matmul %131, %132, %cst_88 {dimension_numbers = #tpu.dot_dimension_numbers<[1], [0], [0], [1], [0, 0, 1, 1], [], []>} : vector<16x3xbf16>, vector<3x208xbf16>, vector<16x208xf32> -> vector<16x208xf32>
    %134 = arith.addf %129, %133 : vector<16x208xf32>
    %c1_89 = arith.constant 1 : index
    %c0_90 = arith.constant 0 : index
    %c0_91 = arith.constant 0 : index
    %135 = vector.load %arg4[%c1_89, %c0_90, %c0_91] : memref<9x16x3xbf16, #tpu.memory_space<vmem>>, vector<1x16x3xbf16>
    %136 = vector.shape_cast %135 : vector<1x16x3xbf16> to vector<16x3xbf16>
    %137 = vector.extract_strided_slice %128 {offsets = [0, 1], sizes = [3, 208], strides = [1, 1]} : vector<3x256xbf16> to vector<3x208xbf16>
    %cst_92 = arith.constant dense<0.000000e+00> : vector<16x208xf32>
    %138 = tpu.matmul %136, %137, %cst_92 {dimension_numbers = #tpu.dot_dimension_numbers<[1], [0], [0], [1], [0, 0, 1, 1], [], []>} : vector<16x3xbf16>, vector<3x208xbf16>, vector<16x208xf32> -> vector<16x208xf32>
    %139 = arith.addf %134, %138 : vector<16x208xf32>
    %c2_93 = arith.constant 2 : index
    %c0_94 = arith.constant 0 : index
    %c0_95 = arith.constant 0 : index
    %140 = vector.load %arg4[%c2_93, %c0_94, %c0_95] : memref<9x16x3xbf16, #tpu.memory_space<vmem>>, vector<1x16x3xbf16>
    %141 = vector.shape_cast %140 : vector<1x16x3xbf16> to vector<16x3xbf16>
    %142 = vector.extract_strided_slice %128 {offsets = [0, 2], sizes = [3, 208], strides = [1, 1]} : vector<3x256xbf16> to vector<3x208xbf16>
    %cst_96 = arith.constant dense<0.000000e+00> : vector<16x208xf32>
    %143 = tpu.matmul %141, %142, %cst_96 {dimension_numbers = #tpu.dot_dimension_numbers<[1], [0], [0], [1], [0, 0, 1, 1], [], []>} : vector<16x3xbf16>, vector<3x208xbf16>, vector<16x208xf32> -> vector<16x208xf32>
    %144 = arith.addf %139, %143 : vector<16x208xf32>
    %c3_97 = arith.constant 3 : index
    %c0_98 = arith.constant 0 : index
    %c0_99 = arith.constant 0 : index
    %145 = vector.load %arg4[%c3_97, %c0_98, %c0_99] : memref<9x16x3xbf16, #tpu.memory_space<vmem>>, vector<1x16x3xbf16>
    %146 = vector.shape_cast %145 : vector<1x16x3xbf16> to vector<16x3xbf16>
    %147 = vector.extract_strided_slice %128 {offsets = [0, 20], sizes = [3, 208], strides = [1, 1]} : vector<3x256xbf16> to vector<3x208xbf16>
    %cst_100 = arith.constant dense<0.000000e+00> : vector<16x208xf32>
    %148 = tpu.matmul %146, %147, %cst_100 {dimension_numbers = #tpu.dot_dimension_numbers<[1], [0], [0], [1], [0, 0, 1, 1], [], []>} : vector<16x3xbf16>, vector<3x208xbf16>, vector<16x208xf32> -> vector<16x208xf32>
    %149 = arith.addf %144, %148 : vector<16x208xf32>
    %c4_101 = arith.constant 4 : index
    %c0_102 = arith.constant 0 : index
    %c0_103 = arith.constant 0 : index
    %150 = vector.load %arg4[%c4_101, %c0_102, %c0_103] : memref<9x16x3xbf16, #tpu.memory_space<vmem>>, vector<1x16x3xbf16>
    %151 = vector.shape_cast %150 : vector<1x16x3xbf16> to vector<16x3xbf16>
    %152 = vector.extract_strided_slice %128 {offsets = [0, 21], sizes = [3, 208], strides = [1, 1]} : vector<3x256xbf16> to vector<3x208xbf16>
    %cst_104 = arith.constant dense<0.000000e+00> : vector<16x208xf32>
    %153 = tpu.matmul %151, %152, %cst_104 {dimension_numbers = #tpu.dot_dimension_numbers<[1], [0], [0], [1], [0, 0, 1, 1], [], []>} : vector<16x3xbf16>, vector<3x208xbf16>, vector<16x208xf32> -> vector<16x208xf32>
    %154 = arith.addf %149, %153 : vector<16x208xf32>
    %c5_105 = arith.constant 5 : index
    %c0_106 = arith.constant 0 : index
    %c0_107 = arith.constant 0 : index
    %155 = vector.load %arg4[%c5_105, %c0_106, %c0_107] : memref<9x16x3xbf16, #tpu.memory_space<vmem>>, vector<1x16x3xbf16>
    %156 = vector.shape_cast %155 : vector<1x16x3xbf16> to vector<16x3xbf16>
    %157 = vector.extract_strided_slice %128 {offsets = [0, 22], sizes = [3, 208], strides = [1, 1]} : vector<3x256xbf16> to vector<3x208xbf16>
    %cst_108 = arith.constant dense<0.000000e+00> : vector<16x208xf32>
    %158 = tpu.matmul %156, %157, %cst_108 {dimension_numbers = #tpu.dot_dimension_numbers<[1], [0], [0], [1], [0, 0, 1, 1], [], []>} : vector<16x3xbf16>, vector<3x208xbf16>, vector<16x208xf32> -> vector<16x208xf32>
    %159 = arith.addf %154, %158 : vector<16x208xf32>
    %c6_109 = arith.constant 6 : index
    %c0_110 = arith.constant 0 : index
    %c0_111 = arith.constant 0 : index
    %160 = vector.load %arg4[%c6_109, %c0_110, %c0_111] : memref<9x16x3xbf16, #tpu.memory_space<vmem>>, vector<1x16x3xbf16>
    %161 = vector.shape_cast %160 : vector<1x16x3xbf16> to vector<16x3xbf16>
    %162 = vector.extract_strided_slice %128 {offsets = [0, 40], sizes = [3, 208], strides = [1, 1]} : vector<3x256xbf16> to vector<3x208xbf16>
    %cst_112 = arith.constant dense<0.000000e+00> : vector<16x208xf32>
    %163 = tpu.matmul %161, %162, %cst_112 {dimension_numbers = #tpu.dot_dimension_numbers<[1], [0], [0], [1], [0, 0, 1, 1], [], []>} : vector<16x3xbf16>, vector<3x208xbf16>, vector<16x208xf32> -> vector<16x208xf32>
    %164 = arith.addf %159, %163 : vector<16x208xf32>
    %c7_113 = arith.constant 7 : index
    %c0_114 = arith.constant 0 : index
    %c0_115 = arith.constant 0 : index
    %165 = vector.load %arg4[%c7_113, %c0_114, %c0_115] : memref<9x16x3xbf16, #tpu.memory_space<vmem>>, vector<1x16x3xbf16>
    %166 = vector.shape_cast %165 : vector<1x16x3xbf16> to vector<16x3xbf16>
    %167 = vector.extract_strided_slice %128 {offsets = [0, 41], sizes = [3, 208], strides = [1, 1]} : vector<3x256xbf16> to vector<3x208xbf16>
    %cst_116 = arith.constant dense<0.000000e+00> : vector<16x208xf32>
    %168 = tpu.matmul %166, %167, %cst_116 {dimension_numbers = #tpu.dot_dimension_numbers<[1], [0], [0], [1], [0, 0, 1, 1], [], []>} : vector<16x3xbf16>, vector<3x208xbf16>, vector<16x208xf32> -> vector<16x208xf32>
    %169 = arith.addf %164, %168 : vector<16x208xf32>
    %c8_117 = arith.constant 8 : index
    %c0_118 = arith.constant 0 : index
    %c0_119 = arith.constant 0 : index
    %170 = vector.load %arg4[%c8_117, %c0_118, %c0_119] : memref<9x16x3xbf16, #tpu.memory_space<vmem>>, vector<1x16x3xbf16>
    %171 = vector.shape_cast %170 : vector<1x16x3xbf16> to vector<16x3xbf16>
    %172 = vector.extract_strided_slice %128 {offsets = [0, 42], sizes = [3, 208], strides = [1, 1]} : vector<3x256xbf16> to vector<3x208xbf16>
    %cst_120 = arith.constant dense<0.000000e+00> : vector<16x208xf32>
    %173 = tpu.matmul %171, %172, %cst_120 {dimension_numbers = #tpu.dot_dimension_numbers<[1], [0], [0], [1], [0, 0, 1, 1], [], []>} : vector<16x3xbf16>, vector<3x208xbf16>, vector<16x208xf32> -> vector<16x208xf32>
    %174 = arith.addf %169, %173 : vector<16x208xf32>
    %c0_121 = arith.constant 0 : index
    %c0_122 = arith.constant 0 : index
    %175 = vector.load %arg5[%c0_121, %c0_122] : memref<16x1xf32, #tpu.memory_space<vmem>>, vector<16x1xf32>
    %176 = vector.broadcast %175 : vector<16x1xf32> to vector<16x208xf32>
    %177 = arith.addf %174, %176 : vector<16x208xf32>
    %cst_123 = arith.constant 0.000000e+00 : f32
    %178 = vector.broadcast %cst_123 : f32 to vector<16x208xf32>
    %179 = arith.maximumf %177, %178 : vector<16x208xf32>
    %c0_124 = arith.constant 0 : index
    %c0_125 = arith.constant 0 : index
    %180 = vector.load %arg9[%c0_124, %c0_125] : memref<1x208xf32, #tpu.memory_space<vmem>>, vector<1x208xf32>
    %181 = vector.broadcast %180 : vector<1x208xf32> to vector<16x208xf32>
    %182 = arith.mulf %179, %181 : vector<16x208xf32>
    %cst_126 = arith.constant 0.000000e+00 : f32
    %183 = vector.shape_cast %11 : vector<1x208xi1> to vector<1x208xi1>
    %184 = vector.broadcast %183 : vector<1x208xi1> to vector<16x208xi1>
    %185 = vector.broadcast %cst_126 : f32 to vector<16x208xf32>
    %186 = arith.select %184, %185, %182 : vector<16x208xi1>, vector<16x208xf32>
    %187 = arith.truncf %186 : vector<16x208xf32> to vector<16x208xbf16>
    %cst_127 = arith.constant 0.000000e+00 : f32
    %188 = vector.broadcast %cst_127 : f32 to vector<32x160xf32>
    %c0_128 = arith.constant 0 : index
    %c0_129 = arith.constant 0 : index
    %c0_130 = arith.constant 0 : index
    %189 = vector.load %arg6[%c0_128, %c0_129, %c0_130] : memref<9x32x16xbf16, #tpu.memory_space<vmem>>, vector<1x32x16xbf16>
    %190 = vector.shape_cast %189 : vector<1x32x16xbf16> to vector<32x16xbf16>
    %191 = vector.extract_strided_slice %187 {offsets = [0, 0], sizes = [16, 160], strides = [1, 1]} : vector<16x208xbf16> to vector<16x160xbf16>
    %cst_131 = arith.constant dense<0.000000e+00> : vector<32x160xf32>
    %192 = tpu.matmul %190, %191, %cst_131 {dimension_numbers = #tpu.dot_dimension_numbers<[1], [0], [0], [1], [0, 0, 1, 1], [], []>} : vector<32x16xbf16>, vector<16x160xbf16>, vector<32x160xf32> -> vector<32x160xf32>
    %193 = arith.addf %188, %192 : vector<32x160xf32>
    %c1_132 = arith.constant 1 : index
    %c0_133 = arith.constant 0 : index
    %c0_134 = arith.constant 0 : index
    %194 = vector.load %arg6[%c1_132, %c0_133, %c0_134] : memref<9x32x16xbf16, #tpu.memory_space<vmem>>, vector<1x32x16xbf16>
    %195 = vector.shape_cast %194 : vector<1x32x16xbf16> to vector<32x16xbf16>
    %196 = vector.extract_strided_slice %187 {offsets = [0, 1], sizes = [16, 160], strides = [1, 1]} : vector<16x208xbf16> to vector<16x160xbf16>
    %cst_135 = arith.constant dense<0.000000e+00> : vector<32x160xf32>
    %197 = tpu.matmul %195, %196, %cst_135 {dimension_numbers = #tpu.dot_dimension_numbers<[1], [0], [0], [1], [0, 0, 1, 1], [], []>} : vector<32x16xbf16>, vector<16x160xbf16>, vector<32x160xf32> -> vector<32x160xf32>
    %198 = arith.addf %193, %197 : vector<32x160xf32>
    %c2_136 = arith.constant 2 : index
    %c0_137 = arith.constant 0 : index
    %c0_138 = arith.constant 0 : index
    %199 = vector.load %arg6[%c2_136, %c0_137, %c0_138] : memref<9x32x16xbf16, #tpu.memory_space<vmem>>, vector<1x32x16xbf16>
    %200 = vector.shape_cast %199 : vector<1x32x16xbf16> to vector<32x16xbf16>
    %201 = vector.extract_strided_slice %187 {offsets = [0, 2], sizes = [16, 160], strides = [1, 1]} : vector<16x208xbf16> to vector<16x160xbf16>
    %cst_139 = arith.constant dense<0.000000e+00> : vector<32x160xf32>
    %202 = tpu.matmul %200, %201, %cst_139 {dimension_numbers = #tpu.dot_dimension_numbers<[1], [0], [0], [1], [0, 0, 1, 1], [], []>} : vector<32x16xbf16>, vector<16x160xbf16>, vector<32x160xf32> -> vector<32x160xf32>
    %203 = arith.addf %198, %202 : vector<32x160xf32>
    %c3_140 = arith.constant 3 : index
    %c0_141 = arith.constant 0 : index
    %c0_142 = arith.constant 0 : index
    %204 = vector.load %arg6[%c3_140, %c0_141, %c0_142] : memref<9x32x16xbf16, #tpu.memory_space<vmem>>, vector<1x32x16xbf16>
    %205 = vector.shape_cast %204 : vector<1x32x16xbf16> to vector<32x16xbf16>
    %206 = vector.extract_strided_slice %187 {offsets = [0, 20], sizes = [16, 160], strides = [1, 1]} : vector<16x208xbf16> to vector<16x160xbf16>
    %cst_143 = arith.constant dense<0.000000e+00> : vector<32x160xf32>
    %207 = tpu.matmul %205, %206, %cst_143 {dimension_numbers = #tpu.dot_dimension_numbers<[1], [0], [0], [1], [0, 0, 1, 1], [], []>} : vector<32x16xbf16>, vector<16x160xbf16>, vector<32x160xf32> -> vector<32x160xf32>
    %208 = arith.addf %203, %207 : vector<32x160xf32>
    %c4_144 = arith.constant 4 : index
    %c0_145 = arith.constant 0 : index
    %c0_146 = arith.constant 0 : index
    %209 = vector.load %arg6[%c4_144, %c0_145, %c0_146] : memref<9x32x16xbf16, #tpu.memory_space<vmem>>, vector<1x32x16xbf16>
    %210 = vector.shape_cast %209 : vector<1x32x16xbf16> to vector<32x16xbf16>
    %211 = vector.extract_strided_slice %187 {offsets = [0, 21], sizes = [16, 160], strides = [1, 1]} : vector<16x208xbf16> to vector<16x160xbf16>
    %cst_147 = arith.constant dense<0.000000e+00> : vector<32x160xf32>
    %212 = tpu.matmul %210, %211, %cst_147 {dimension_numbers = #tpu.dot_dimension_numbers<[1], [0], [0], [1], [0, 0, 1, 1], [], []>} : vector<32x16xbf16>, vector<16x160xbf16>, vector<32x160xf32> -> vector<32x160xf32>
    %213 = arith.addf %208, %212 : vector<32x160xf32>
    %c5_148 = arith.constant 5 : index
    %c0_149 = arith.constant 0 : index
    %c0_150 = arith.constant 0 : index
    %214 = vector.load %arg6[%c5_148, %c0_149, %c0_150] : memref<9x32x16xbf16, #tpu.memory_space<vmem>>, vector<1x32x16xbf16>
    %215 = vector.shape_cast %214 : vector<1x32x16xbf16> to vector<32x16xbf16>
    %216 = vector.extract_strided_slice %187 {offsets = [0, 22], sizes = [16, 160], strides = [1, 1]} : vector<16x208xbf16> to vector<16x160xbf16>
    %cst_151 = arith.constant dense<0.000000e+00> : vector<32x160xf32>
    %217 = tpu.matmul %215, %216, %cst_151 {dimension_numbers = #tpu.dot_dimension_numbers<[1], [0], [0], [1], [0, 0, 1, 1], [], []>} : vector<32x16xbf16>, vector<16x160xbf16>, vector<32x160xf32> -> vector<32x160xf32>
    %218 = arith.addf %213, %217 : vector<32x160xf32>
    %c6_152 = arith.constant 6 : index
    %c0_153 = arith.constant 0 : index
    %c0_154 = arith.constant 0 : index
    %219 = vector.load %arg6[%c6_152, %c0_153, %c0_154] : memref<9x32x16xbf16, #tpu.memory_space<vmem>>, vector<1x32x16xbf16>
    %220 = vector.shape_cast %219 : vector<1x32x16xbf16> to vector<32x16xbf16>
    %221 = vector.extract_strided_slice %187 {offsets = [0, 40], sizes = [16, 160], strides = [1, 1]} : vector<16x208xbf16> to vector<16x160xbf16>
    %cst_155 = arith.constant dense<0.000000e+00> : vector<32x160xf32>
    %222 = tpu.matmul %220, %221, %cst_155 {dimension_numbers = #tpu.dot_dimension_numbers<[1], [0], [0], [1], [0, 0, 1, 1], [], []>} : vector<32x16xbf16>, vector<16x160xbf16>, vector<32x160xf32> -> vector<32x160xf32>
    %223 = arith.addf %218, %222 : vector<32x160xf32>
    %c7_156 = arith.constant 7 : index
    %c0_157 = arith.constant 0 : index
    %c0_158 = arith.constant 0 : index
    %224 = vector.load %arg6[%c7_156, %c0_157, %c0_158] : memref<9x32x16xbf16, #tpu.memory_space<vmem>>, vector<1x32x16xbf16>
    %225 = vector.shape_cast %224 : vector<1x32x16xbf16> to vector<32x16xbf16>
    %226 = vector.extract_strided_slice %187 {offsets = [0, 41], sizes = [16, 160], strides = [1, 1]} : vector<16x208xbf16> to vector<16x160xbf16>
    %cst_159 = arith.constant dense<0.000000e+00> : vector<32x160xf32>
    %227 = tpu.matmul %225, %226, %cst_159 {dimension_numbers = #tpu.dot_dimension_numbers<[1], [0], [0], [1], [0, 0, 1, 1], [], []>} : vector<32x16xbf16>, vector<16x160xbf16>, vector<32x160xf32> -> vector<32x160xf32>
    %228 = arith.addf %223, %227 : vector<32x160xf32>
    %c8_160 = arith.constant 8 : index
    %c0_161 = arith.constant 0 : index
    %c0_162 = arith.constant 0 : index
    %229 = vector.load %arg6[%c8_160, %c0_161, %c0_162] : memref<9x32x16xbf16, #tpu.memory_space<vmem>>, vector<1x32x16xbf16>
    %230 = vector.shape_cast %229 : vector<1x32x16xbf16> to vector<32x16xbf16>
    %231 = vector.extract_strided_slice %187 {offsets = [0, 42], sizes = [16, 160], strides = [1, 1]} : vector<16x208xbf16> to vector<16x160xbf16>
    %cst_163 = arith.constant dense<0.000000e+00> : vector<32x160xf32>
    %232 = tpu.matmul %230, %231, %cst_163 {dimension_numbers = #tpu.dot_dimension_numbers<[1], [0], [0], [1], [0, 0, 1, 1], [], []>} : vector<32x16xbf16>, vector<16x160xbf16>, vector<32x160xf32> -> vector<32x160xf32>
    %233 = arith.addf %228, %232 : vector<32x160xf32>
    %c0_164 = arith.constant 0 : index
    %c0_165 = arith.constant 0 : index
    %234 = vector.load %arg7[%c0_164, %c0_165] : memref<32x1xf32, #tpu.memory_space<vmem>>, vector<32x1xf32>
    %235 = vector.broadcast %234 : vector<32x1xf32> to vector<32x160xf32>
    %236 = arith.addf %233, %235 : vector<32x160xf32>
    %cst_166 = arith.constant 0.000000e+00 : f32
    %237 = vector.broadcast %cst_166 : f32 to vector<32x160xf32>
    %238 = arith.maximumf %236, %237 : vector<32x160xf32>
    %239 = arith.truncf %238 : vector<32x160xf32> to vector<32x160xbf16>
    %c0_167 = arith.constant 0 : index
    %c0_168 = arith.constant 0 : index
    %240 = vector.load %arg8[%c0_167, %c0_168] : memref<19x32xbf16, #tpu.memory_space<vmem>>, vector<19x32xbf16>
    %cst_169 = arith.constant dense<0.000000e+00> : vector<19x160xf32>
    %241 = tpu.matmul %240, %239, %cst_169 {dimension_numbers = #tpu.dot_dimension_numbers<[1], [0], [0], [1], [0, 0, 1, 1], [], []>} : vector<19x32xbf16>, vector<32x160xbf16>, vector<19x160xf32> -> vector<19x160xf32>
    %242 = tpu.iota {dimensions = array<i32: 0>} : vector<19x160xi32>
    %cst_170 = arith.constant dense<0xFF800000> : vector<160xf32>
    %243 = vector.multi_reduction <maximumf>, %126, %cst_170 [0] : vector<19x160xf32> to vector<160xf32>
    %244 = vector.shape_cast %243 : vector<160xf32> to vector<1x160xf32>
    %245 = vector.broadcast %244 : vector<1x160xf32> to vector<19x160xf32>
    %246 = arith.cmpf oeq, %126, %245 : vector<19x160xf32>
    %c19_i32 = arith.constant 19 : i32
    %247 = vector.broadcast %c19_i32 : i32 to vector<19x160xi32>
    %248 = arith.select %246, %242, %247 : vector<19x160xi1>, vector<19x160xi32>
    %cst_171 = arith.constant dense<2147483647> : vector<160xi32>
    %249 = vector.multi_reduction <minsi>, %248, %cst_171 [0] : vector<19x160xi32> to vector<160xi32>
    %250 = vector.shape_cast %249 : vector<160xi32> to vector<1x160xi32>
    %cst_172 = arith.constant dense<0xFF800000> : vector<160xf32>
    %251 = vector.multi_reduction <maximumf>, %241, %cst_172 [0] : vector<19x160xf32> to vector<160xf32>
    %252 = vector.shape_cast %251 : vector<160xf32> to vector<1x160xf32>
    %253 = vector.broadcast %252 : vector<1x160xf32> to vector<19x160xf32>
    %254 = arith.cmpf oeq, %241, %253 : vector<19x160xf32>
    %c19_i32_173 = arith.constant 19 : i32
    %255 = vector.broadcast %c19_i32_173 : i32 to vector<19x160xi32>
    %256 = arith.select %254, %242, %255 : vector<19x160xi1>, vector<19x160xi32>
    %cst_174 = arith.constant dense<2147483647> : vector<160xi32>
    %257 = vector.multi_reduction <minsi>, %256, %cst_174 [0] : vector<19x160xi32> to vector<160xi32>
    %258 = vector.shape_cast %257 : vector<160xi32> to vector<1x160xi32>
    %259 = arith.cmpi eq, %250, %258 : vector<1x160xi32>
    %260 = arith.extui %259 : vector<1x160xi1> to vector<1x160xi32>
    %261 = arith.sitofp %260 : vector<1x160xi32> to vector<1x160xf32>
    %c0_175 = arith.constant 0 : index
    %c0_176 = arith.constant 0 : index
    %262 = vector.load %arg10[%c0_175, %c0_176] : memref<1x160xf32, #tpu.memory_space<vmem>>, vector<1x160xf32>
    %263 = arith.mulf %261, %262 : vector<1x160xf32>
    %264 = vector.shape_cast %263 : vector<1x160xf32> to vector<1x1x160xf32>
    %cst_177 = arith.constant dense<0.000000e+00> : vector<1xf32>
    %265 = vector.multi_reduction <add>, %264, %cst_177 [1, 2] : vector<1x1x160xf32> to vector<1xf32>
    %266 = vector.shape_cast %265 : vector<1xf32> to vector<1x1x1xf32>
    %267 = vector.extract %266[0, 0, 0] : f32 from vector<1x1x1xf32>
    %c0_i32_178 = arith.constant 0 : i32
    %268 = arith.cmpi eq, %arg1, %c0_i32_178 : i32
    %269 = arith.extui %268 : i1 to i32
    %c0_i32_179 = arith.constant 0 : i32
    %270 = arith.cmpi ne, %269, %c0_i32_179 : i32
    scf.if %270 {
      %cst_186 = arith.constant 0.000000e+00 : f32
      %275 = vector.broadcast %cst_186 : f32 to vector<1x1x128xf32>
      %c0_187 = arith.constant 0 : index
      %c0_188 = arith.constant 0 : index
      %c0_189 = arith.constant 0 : index
      %276 = vector.load %arg11[%c0_187, %c0_188, %c0_189] : memref<1x1x128xf32, #tpu.memory_space<vmem>>, vector<1x1x128xf32>
      tpu.vector_store %arg11[%c0_187, %c0_188, %c0_189], %275 {strides = array<i32>} : memref<1x1x128xf32, #tpu.memory_space<vmem>>, vector<1x1x128xf32>,
    } else {
    }
    %c0_180 = arith.constant 0 : index
    %c0_181 = arith.constant 0 : index
    %c0_182 = arith.constant 0 : index
    %271 = vector.load %arg11[%c0_180, %c0_181, %c0_182] : memref<1x1x128xf32, #tpu.memory_space<vmem>>, vector<1x1x128xf32>
    %272 = vector.broadcast %267 : f32 to vector<1x1x128xf32>
    %273 = arith.addf %271, %272 : vector<1x1x128xf32>
    %c0_183 = arith.constant 0 : index
    %c0_184 = arith.constant 0 : index
    %c0_185 = arith.constant 0 : index
    %274 = vector.load %arg11[%c0_183, %c0_184, %c0_185] : memref<1x1x128xf32, #tpu.memory_space<vmem>>, vector<1x1x128xf32>
    tpu.vector_store %arg11[%c0_183, %c0_184, %c0_185], %273 {strides = array<i32>} : memref<1x1x128xf32, #tpu.memory_space<vmem>>, vector<1x1x128xf32>,
    return
  }
  func.func @transform_0(%arg0: i32, %arg1: i32) -> (i32, i32, i32, i32) {
    %c0_i32 = arith.constant 0 : i32
    %c0_i32_0 = arith.constant 0 : i32
    %c0_i32_1 = arith.constant 0 : i32
    return %arg0, %arg1, %c0_i32, %c0_i32_0 : i32, i32, i32, i32
  }
  func.func @transform_1(%arg0: i32, %arg1: i32) -> (i32, i32, i32, i32) {
    %c0_i32 = arith.constant 0 : i32
    %c0_i32_0 = arith.constant 0 : i32
    %c0_i32_1 = arith.constant 0 : i32
    return %arg0, %arg1, %c0_i32, %c0_i32_0 : i32, i32, i32, i32
  }
  func.func @transform_2(%arg0: i32, %arg1: i32) -> (i32, i32, i32) {
    %c0_i32 = arith.constant 0 : i32
    %c0_i32_0 = arith.constant 0 : i32
    %c0_i32_1 = arith.constant 0 : i32
    %c0_i32_2 = arith.constant 0 : i32
    return %c0_i32, %c0_i32_0, %c0_i32_1 : i32, i32, i32
  }
  func.func @transform_3(%arg0: i32, %arg1: i32) -> (i32, i32) {
    %c0_i32 = arith.constant 0 : i32
    %c0_i32_0 = arith.constant 0 : i32
    %c0_i32_1 = arith.constant 0 : i32
    return %c0_i32, %c0_i32_0 : i32, i32
  }
  func.func @transform_4(%arg0: i32, %arg1: i32) -> (i32, i32, i32) {
    %c0_i32 = arith.constant 0 : i32
    %c0_i32_0 = arith.constant 0 : i32
    %c0_i32_1 = arith.constant 0 : i32
    %c0_i32_2 = arith.constant 0 : i32
    return %c0_i32, %c0_i32_0, %c0_i32_1 : i32, i32, i32
  }
  func.func @transform_5(%arg0: i32, %arg1: i32) -> (i32, i32) {
    %c0_i32 = arith.constant 0 : i32
    %c0_i32_0 = arith.constant 0 : i32
    %c0_i32_1 = arith.constant 0 : i32
    return %c0_i32, %c0_i32_0 : i32, i32
  }
  func.func @transform_6(%arg0: i32, %arg1: i32) -> (i32, i32) {
    %c0_i32 = arith.constant 0 : i32
    %c0_i32_0 = arith.constant 0 : i32
    %c0_i32_1 = arith.constant 0 : i32
    return %c0_i32, %c0_i32_0 : i32, i32
  }
  func.func @transform_7(%arg0: i32, %arg1: i32) -> (i32, i32) {
    %c0_i32 = arith.constant 0 : i32
    %c0_i32_0 = arith.constant 0 : i32
    %c0_i32_1 = arith.constant 0 : i32
    return %c0_i32, %c0_i32_0 : i32, i32
  }
  func.func @transform_8(%arg0: i32, %arg1: i32) -> (i32, i32) {
    %c0_i32 = arith.constant 0 : i32
    %c0_i32_0 = arith.constant 0 : i32
    %c0_i32_1 = arith.constant 0 : i32
    return %c0_i32, %c0_i32_0 : i32, i32
  }
  func.func @transform_9(%arg0: i32, %arg1: i32) -> (i32, i32, i32) {
    %c0_i32 = arith.constant 0 : i32
    %c0_i32_0 = arith.constant 0 : i32
    %c0_i32_1 = arith.constant 0 : i32
    return %arg0, %c0_i32, %c0_i32_0 : i32, i32, i32
  }
}

</mosaic_0001>

<bundles_post_ra>
// kernel: _lambda_.1
= control target key start
LH: loop header
LB: loop body
LE: loop exit
PB: predicated region body
PF: predicated region fallthrough
CT: control target
= control target key end

     0   :  { %s3804_s30 = smov 0   ;;  %s3806_s10 = smov 0   ;;  %s4666_s0 = inlined_call_operand.vmem [shape: bf16[2,2,3,256], index: 0, kind: input, shape index: {}]   ;;  %s4667_s1 = inlined_call_operand.vmem [shape: bf16[2,2,3,256], index: 1, kind: input, shape index: {}]   ;;  %s4668_s2 = inlined_call_operand.vmem [shape: bf16[9,16,3], index: 2, kind: input, shape index: {}]   ;;  %s4669_s3 = inlined_call_operand.vmem [shape: f32[16,1], index: 3, kind: input, shape index: {}]   ;;  %s4670_s4 = inlined_call_operand.vmem [shape: bf16[9,32,16], index: 4, kind: input, shape index: {}]   ;;  %s4671_s5 = inlined_call_operand.vmem [shape: f32[32,1], index: 5, kind: input, shape index: {}]   ;;  %s4672_s6 = inlined_call_operand.vmem [shape: bf16[19,32], index: 6, kind: input, shape index: {}]   ;;  %s4673_s7 = inlined_call_operand.vmem [shape: f32[1,208], index: 7, kind: input, shape index: {}]   ;;  %s4674_s8 = inlined_call_operand.vmem [shape: f32[1,160], index: 8, kind: input, shape index: {}]   ;;  %s4675_s9 = inlined_call_operand.vmem [shape: f32[2,1,128], index: 9, kind: output, shape index: {}]  }
   0x1   :  { %s3808_s11 = smov 0   ;;  %s3810_s12 = smov 0  }
   0x2   :  { %s3812_s13 = smov 0  }
   0x3 LB: > { %s28_s14 = sadd.s32 1, %s3732_s11  ;;  %s31_s15 = sadd.s32 1, %s3736_s12  ;;  %s3740_s13 = sphi %s3812_s13, %s19_s13   ;;  %s3736_s12 = sphi %s3810_s12, %s4888_s12   ;;  %s3732_s11 = sphi %s3808_s11, %s4887_s11   ;;  %s3728_s10 = sphi %s3806_s10, %s4886_s10   ;;  %s3724_s30 = sphi %s3804_s30, %s4885_s30  }
   0x4   : > { %p29_p0 = scmp.ge.s32.totalorder %s28_s14, 2  ;;  %p3442_p1 = scmp.ge.s32.totalorder %s3740_s13, 1 }
   0x5   : > { %p321_p2 = scmp.lt.s32.totalorder %s3740_s13, 5 }
   0x6   : > { %s4890_s14 = smov (%p29_p0, %s28_s14), 0  ;;  %s4892_s15 = smov (!%p29_p0, %s31_s15), %s3736_s12 }
   0x7   : > { %p322_p3 = pnand %p3442_p1, %p321_p2  ;;  %p33_p4 = scmp.ge.s32.totalorder %s4892_s15, 2 }
   0x9   : > { %s4894_s15 = smov (%p33_p4, %s4892_s15), 0  ;;  %325 = sbr.rel (%p322_p3) target bundleno = 1913 (0x779), region = 56 }
   0xe   : > { %p368_p5 = scmp.lt.s32.totalorder %s3728_s10, 1  ;;  %p370_p6 = scmp.lt.s32.totalorder %s3724_s30, 1  ;;  %vm4733_vm0 = vcmask 1040384   ;;  %vm442_vm1 = vcmask 1041408   ;;  %v4689_v0 = vmov 0   ;;  %v3743_v1 = vmov 65535  }
   0xf   : > { %483 = vmatprep.mubr.bf16.mxu0 %v4689_v0  ;;  %540 = vmatprep.mubr.bf16.mxu1 %v4689_v0  ;;  %v443_v2 = vsel %vm4733_vm0, 4294967295, %v3743_v1  ;;  %s3744_s27 = smov 127   ;;  %s3745_s28 = smov 126   ;;  %vm437_vm2 = vcmask 23552   ;;  %v3668_v8 = vld [vmem:[%s4668_s2] sm:$0xff]   ;;  %v1042_v10 = vld [vmem:[%s4669_s3 + $0x8] sm:$0xff] }
  0x10   : > { %s4896_s10 = smov (!%p368_p5, %s3728_s10), 1  ;;  %3665 = vset.pattern.permute.xlu0 %v4689_v0  ;;  %3666 = vset.pattern.permute.xlu1 %v4689_v0  ;;  %v3856_v4 = vsel %vm442_vm1, %v443_v2, 0  ;;  %s4676_s18 = smov 106   ;;  %v1041_v9 = vld [vmem:[%s4669_s3] sm:$0xff]  ;;  %vm435_vm3 = vcmask 1039360   ;;  %vm4740_vm4 = vcmask 1031168  }
  0x11   : > { %s371_s16 = scalar_select %p370_p6, %s3724_s30, 1  ;;  %4755 = vst [vmem:[#allocation2_spill] sm:$0xff] %v3856_v4  ;;  %vm4739_vm5 = vcmask 883712   ;;  %v3895_v20 = vld [vmem:[%s4668_s2 + $0x8] sm:$0xff]   ;;  %vm4737_vm6 = vcmask 875520   ;;  %v3670_v27 = vld [vmem:[%s4668_s2 + $0x18] sm:$0xff]  }
  0x12   : > { %s3444_s17 = sshll.u32 %s4896_s10, 2  ;;  %s3841_s20 = scalar_lea.vmem %s4675_s9, %s4896_s10  ;;  %vm4738_vm7 = vcmask 867328   ;;  %v3912_v32 = vld [vmem:[%s4668_s2 + $0x10] sm:$0xff]   ;;  %vm4735_vm8 = vcmask 719872   ;;  %v3672_v39 = vld [vmem:[%s4668_s2 + $0x28] sm:$0xff]   ;;  %vm4736_vm9 = vcmask 711680  }
  0x13   : > { %s3443_s21 = sshll.u32 %s371_s16, 1  ;;  %s4684_s16 = smov 108   ;;  %v3931_v44 = vld [vmem:[%s4668_s2 + $0x20] sm:$0xff]   ;;  %vm4734_vm10 = vcmask 703488   ;;  %v3674_v51 = vld [vmem:[%s4668_s2 + $0x38] sm:$0xff]   ;;  %v3950_v56 = vld [vmem:[%s4668_s2 + $0x30] sm:$0xff]  }
  0x14   : > { %s3845_s22 = sadd.s32 %s3444_s17, %s3443_s21  ;;  %s4678_s17 = smov 107   ;;  %v3961_v58 = vld [vmem:[%s4668_s2 + $0x40] sm:$0xff]   ;;  %vm3195_vm0 = vcmask 256000  }
  0x15   : > { %s3445_s23 = sshll.u32 %s3845_s22, 1  ;;  %s4680_s19 = smov 88  }
  0x16   : > { %s376_s26 = scalar_lea.vmem %s4666_s0, %s3445_s23  ;;  %s4682_s21 = smov 87  }
  0x17   : > { %v3452_v3 = vld.sshfl [vmem:[%s376_s26] sm:$0x33 pattern:$0x76325410]  ;;  %s3751_s24 = smov 86   ;;  %p393_p7 = scmp.eq.s32.totalorder %s3724_s30, 0 }
  0x18   : > { %431 = vrot.lane.b32.xlu0 %v3452_v3, %s3744_s27  ;;  %559 = vrot.lane.b32.xlu1 %v3452_v3, %s3745_s28  ;;  %v430_v5 = vcombine.high %v3452_v3, %v3452_v3  ;;  %v503_v7 = vand.u32 %v3452_v3, %v3856_v4  ;;  %p401_p8 = scmp.eq.s32.totalorder %s3724_s30, 1  ;;  %s4776_s22 = smov 106  }
  0x19   : > { %s396_s25 = scalar_select %p393_p7, 1, 0 }
  0x1a   : > { %v506_v6 = vand.u32 %v3856_v4, %v430_v5  ;;  %s404_s26 = scalar_select %p401_p8, 1, 0 }
  0x1b   : > { %p3608_p9 = scmp.ne.s32.totalorder %s3724_s30, 0 }
  0x1c   : > { %433 = vrot.lane.b32.xlu0 %v430_v5, %s3744_s27  ;;  %561 = vrot.lane.b32.xlu1 %v430_v5, %s3745_s28 }
  0x1d   : > { %522 = vmatprep.subr.bf16.mxu1 %v506_v6 }
  0x1e   : > { %523 = vmatpush1.bf16.msra.mxu1 %v503_v7 }
  0x20   : > { %631 = vrot.lane.b32.xlu1 %v430_v5, %s4684_s16  ;;  %629 = vrot.lane.b32.xlu0 %v3452_v3, %s4684_s16 }
  0x21   : > { %3455 = vmatmul.mubr.msk.bf16.vlgmr.msra.gmra.mxu1 %vm437_vm2, %v3668_v8 }
  0x22   : > { %676 = vmatprep.mubr.bf16.mxu1 %v4689_v0 }
  0x24   : > { %701 = vrot.lane.b32.xlu1 %v430_v5, %s4678_s17  ;;  %699 = vrot.lane.b32.xlu0 %v3452_v3, %s4678_s17 }
  0x28   : > { %771 = vrot.lane.b32.xlu1 %v430_v5, %s4676_s18  ;;  %769 = vrot.lane.b32.xlu0 %v3452_v3, %s4676_s18 }
  0x2c   : > { %841 = vrot.lane.b32.xlu1 %v430_v5, %s4680_s19  ;;  %839 = vrot.lane.b32.xlu0 %v3452_v3, %s4680_s19 }
  0x30   : > { %911 = vrot.lane.b32.xlu1 %v430_v5, %s4682_s21  ;;  %909 = vrot.lane.b32.xlu0 %v3452_v3, %s4682_s21 }
  0x34   : > { %981 = vrot.lane.b32.xlu1 %v430_v5, %s3751_s24  ;;  %979 = vrot.lane.b32.xlu0 %v3452_v3, %s3751_s24 }
  0x38   : > { %1045 = vperm.xlu0 %3665, %v1041_v9   ;;  %1050 = vperm.xlu1 %3666, %v1042_v10  }
  0x8a   : > { %v432_v11 = vpop.permute.xlu0 %431  ;;  %v560_v12 = vpop.permute.xlu1 %559 }
  0x8e   : > { %v434_v13 = vpop.permute.xlu0 %433  ;;  %v562_v14 = vpop.permute.xlu1 %561 }
  0x8f   : > { %v436_v15 = vsel %vm435_vm3, %v432_v11, %v434_v13  ;;  %v449_v16 = vand.u32 %v3856_v4, %v434_v13  ;;  %v564_v17 = vsel %vm4740_vm4, %v560_v12, %v562_v14  ;;  %v572_v18 = vand.u32 %v562_v14, %v3856_v4 }
  0x90   : > { %v446_v19 = vand.u32 %v3856_v4, %v436_v15  ;;  %v569_v21 = vand.u32 %v564_v17, %v3856_v4 }
  0x91   : > { %465 = vmatprep.subr.bf16.mxu0 %v449_v16 }
  0x92   : > { %466 = vmatpush1.bf16.msra.mxu0 %v446_v19  ;;  %v632_v22 = vpop.permute.xlu1 %631  ;;  %v630_v23 = vpop.permute.xlu0 %629 }
  0x93   : > { %588 = vmatprep.subr.bf16.mxu0 %v572_v18  ;;  %v642_v24 = vand.u32 %v632_v22, %v3856_v4  ;;  %v634_v25 = vsel %vm4739_vm5, %v630_v23, %v632_v22 }
  0x94   : > { %v639_v26 = vand.u32 %v634_v25, %v3856_v4 }
  0x95   : > { %3453 = vmatmul.mubr.msk.bf16.vlgmr.msra.gmra.mxu0 %vm437_vm2, %v3895_v20  ;;  %658 = vmatprep.subr.bf16.mxu1 %v642_v24 }
  0x96   : > { %589 = vmatpush1.bf16.msra.mxu0 %v569_v21  ;;  %v702_v28 = vpop.permute.xlu1 %701  ;;  %v700_v29 = vpop.permute.xlu0 %699  ;;  %659 = vmatpush1.bf16.msra.mxu1 %v639_v26 }
  0x97   : > { %v712_v30 = vand.u32 %v702_v28, %v3856_v4  ;;  %v704_v31 = vsel %vm4737_vm6, %v700_v29, %v702_v28  ;;  %606 = vmatprep.mubr.bf16.mxu0 %v4689_v0 }
  0x98   : > { %v709_v33 = vand.u32 %v704_v31, %v3856_v4 }
  0x99   : > { %3463 = vmatmul.mubr.msk.bf16.vlgmr.msra.gmra.mxu1 %vm437_vm2, %v3670_v27  ;;  %728 = vmatprep.subr.bf16.mxu0 %v712_v30 }
  0x9a   : > { %v772_v34 = vpop.permute.xlu1 %771  ;;  %v770_v35 = vpop.permute.xlu0 %769  ;;  %816 = vmatprep.mubr.bf16.mxu1 %v4689_v0 }
  0x9b   : > { %v782_v36 = vand.u32 %v772_v34, %v3856_v4  ;;  %v774_v37 = vsel %vm4738_vm7, %v770_v35, %v772_v34 }
  0x9c   : > { %v779_v38 = vand.u32 %v774_v37, %v3856_v4 }
  0x9d   : > { %3459 = vmatmul.mubr.msk.bf16.vlgmr.msra.gmra.mxu0 %vm437_vm2, %v3912_v32  ;;  %798 = vmatprep.subr.bf16.mxu1 %v782_v36 }
  0x9e   : > { %v842_v40 = vpop.permute.xlu1 %841  ;;  %729 = vmatpush1.bf16.msra.mxu0 %v709_v33  ;;  %v840_v41 = vpop.permute.xlu0 %839  ;;  %799 = vmatpush1.bf16.msra.mxu1 %v779_v38  ;;  %v390_v38 = vlaneseq }
  0x9f   : > { %v852_v42 = vand.u32 %v842_v40, %v3856_v4  ;;  %v844_v43 = vsel %vm4735_vm8, %v840_v41, %v842_v40  ;;  %746 = vmatprep.mubr.bf16.mxu0 %v4689_v0 }
  0xa0   : > { %v849_v45 = vand.u32 %v844_v43, %v3856_v4 }
  0xa1   : > { %3471 = vmatmul.mubr.msk.bf16.vlgmr.msra.gmra.mxu1 %vm437_vm2, %v3672_v39  ;;  %868 = vmatprep.subr.bf16.mxu0 %v852_v42 }
  0xa2   : > { %v912_v46 = vpop.permute.xlu1 %911  ;;  %v910_v47 = vpop.permute.xlu0 %909  ;;  %956 = vmatprep.mubr.bf16.mxu1 %v4689_v0 }
  0xa3   : > { %v922_v48 = vand.u32 %v912_v46, %v3856_v4  ;;  %v914_v49 = vsel %vm4736_vm9, %v910_v47, %v912_v46 }
  0xa4   : > { %v919_v50 = vand.u32 %v914_v49, %v3856_v4  ;;  %v3967_v49 = vshrl.u32 %v390_v38, 7 }
  0xa5   : > { %3467 = vmatmul.mubr.msk.bf16.vlgmr.msra.gmra.mxu0 %vm437_vm2, %v3931_v44  ;;  %938 = vmatprep.subr.bf16.mxu1 %v922_v48 }
  0xa6   : > { %869 = vmatpush1.bf16.msra.mxu0 %v849_v45  ;;  %939 = vmatpush1.bf16.msra.mxu1 %v919_v50  ;;  %v982_v52 = vpop.permute.xlu1 %981  ;;  %v980_v53 = vpop.permute.xlu0 %979  ;;  %4756 = vst [vmem:[#allocation3_spill] sm:$0xff] %v3967_v49 }
  0xa7   : > { %886 = vmatprep.mubr.bf16.mxu0 %v4689_v0  ;;  %v992_v54 = vand.u32 %v982_v52, %v3856_v4  ;;  %v984_v55 = vsel %vm4734_vm10, %v980_v53, %v982_v52  ;;  %v391_v53 = vand.u32 127, %v390_v38 }
  0xa8   : > { %v989_v57 = vand.u32 %v984_v55, %v3856_v4 }
  0xa9   : > { %3479 = vmatmul.mubr.msk.bf16.vlgmr.msra.gmra.mxu1 %vm437_vm2, %v3674_v51  ;;  %1008 = vmatprep.subr.bf16.mxu0 %v992_v54  ;;  %vm394_vm11 = vcmp.lt.s32.totalorder %v391_v53, 20 }
  0xaa   : > { %1154 = vmatprep.mubr.bf16.mxu1 %v4689_v0 }
  0xad   : > { %3475 = vmatmul.mubr.msk.bf16.vlgmr.msra.gmra.mxu0 %vm437_vm2, %v3950_v56 }
  0xae   : > { %1009 = vmatpush1.bf16.msra.mxu0 %v989_v57  ;;  %1026 = vmatprep.mubr.bf16.mxu0 %v4689_v0 }
  0xb5   : > { %3483 = vmatmul.mubr.msk.bf16.vlgmr.msra.gmra.mxu0 %vm437_vm2, %v3961_v58 }
  0xb6   : > { %1223 = vmatprep.mubr.bf16.mxu0 %v4689_v0 }
  0xe1   : > { %v542_v59 = vpop.f32.mrf.mxu1 }
  0xe3   : > { %v544_v60 = vpop.f32.mrf.mxu1 }
  0xe5   : > { %v546_v61 = vpop.f32.mrf.mxu1 }
  0xe7   : > { %v548_v63 = vpop.f32.mrf.mxu1 }
 0x155   : > { %v485_v62 = vpop.f32.mrf.mxu0 }
 0x156   : > { %v543_v13 = vadd.f32 %v542_v59, %v485_v62  ;;  %v3970_v59 = vpop.permute.xlu0 %1045  ;;  %v4687_v62 = vsub.s32 0, %v3967_v49 }
 0x157   : > { %v487_v1 = vpop.f32.mrf.mxu0  ;;  %4757 = vst [vmem:[#allocation4_spill] sm:$0xff] %v3970_v59 }
 0x158   : > { %v545_v16 = vadd.f32 %v544_v60, %v487_v1 }
 0x159   : > { %v489_v2 = vpop.f32.mrf.mxu0  ;;  %v678_v3 = vpop.f32.mrf.mxu1 }
 0x15a   : > { %v547_v21 = vadd.f32 %v546_v61, %v489_v2 }
 0x15b   : > { %v491_v5 = vpop.f32.mrf.mxu0  ;;  %v680_v6 = vpop.f32.mrf.mxu1 }
 0x15c   : > { %v549_v24 = vadd.f32 %v548_v63, %v491_v5 }
 0x15d   : > { %v608_v7 = vpop.f32.mrf.mxu0  ;;  %v682_v8 = vpop.f32.mrf.mxu1 }
 0x15e   : > { %v617_v17 = vadd.f32 %v608_v7, %v543_v13  ;;  %v392_v7 = vadd.s32 128, %v391_v53  ;;  %v1867_v53 = vld [vmem:[%s4671_s5] sm:$0xff] }
 0x15f   : > { %v610_v9 = vpop.f32.mrf.mxu0  ;;  %v684_v10 = vpop.f32.mrf.mxu1 }
 0x160   : > { %v618_v22 = vadd.f32 %v610_v9, %v545_v16  ;;  %v687_v25 = vadd.f32 %v678_v3, %v617_v17  ;;  %v1061_v3 = vld [vmem:[%s4673_s7] sm:$0x3]  ;;  %v405_v16 = vstv %s404_s26  ;;  %vm403_vm13 = vcmp.ge.s32.totalorder %v392_v7, 180  ;;  %s385_s26 = scalar_lea.vmem %s4667_s1, %s3445_s23  ;;  %s4777_s23 = smov 88  }
 0x161   : > { %v612_v11 = vpop.f32.mrf.mxu0  ;;  %v818_v12 = vpop.f32.mrf.mxu1  ;;  %vm406_vm14 = vcmp.eq.s32.totalorder %v405_v16, 1 }
 0x162   : > { %v619_v26 = vadd.f32 %v612_v11, %v547_v21  ;;  %v688_v29 = vadd.f32 %v680_v6, %v618_v22  ;;  %v4686_v6 = vsub.s32 1, %v3967_v49  ;;  %vm3996_vm1 = vmand %vm406_vm14, %vm403_vm13 }
 0x163   : > { %v614_v14 = vpop.f32.mrf.mxu0  ;;  %v820_v15 = vpop.f32.mrf.mxu1 }
 0x164   : > { %v620_v30 = vadd.f32 %v614_v14, %v549_v24  ;;  %v689_v34 = vadd.f32 %v682_v8, %v619_v26  ;;  %v3982_v14 = vrot.slane %v1061_v3, %v4687_v62  ;;  %v3987_v22 = vrot.slane %v1061_v3, %v4686_v6 }
 0x165   : > { %v748_v18 = vpop.f32.mrf.mxu0  ;;  %v822_v19 = vpop.f32.mrf.mxu1 }
 0x166   : > { %v757_v31 = vadd.f32 %v748_v18, %v687_v25  ;;  %v690_v39 = vadd.f32 %v684_v10, %v620_v30  ;;  %v397_v10 = vstv %s396_s25  ;;  %4759 = vst [vmem:[#allocation6_spill] sm:$0xff] %v3982_v14  ;;  %4760 = vst [vmem:[#allocation7_spill] sm:$0xff] %v3987_v22 }
 0x167   : > { %v750_v23 = vpop.f32.mrf.mxu0  ;;  %v824_v28 = vpop.f32.mrf.mxu1  ;;  %vm398_vm12 = vcmp.eq.s32.totalorder %v397_v10, 1  ;;  %v4122_v10 = vld [vmem:[%s4670_s4 + $0x18] sm:$0xff]  }
 0x168   : > { %v758_v35 = vadd.f32 %v750_v23, %v688_v29  ;;  %v827_v40 = vadd.f32 %v818_v12, %v757_v31  ;;  %v3978_v12 = vpop.permute.xlu1 %1050  ;;  %vm3990_vm15 = vmand %vm398_vm12, %vm394_vm11  ;;  %v4764_v31 = vmov 0  ;;  %4781 = vst [vmem:[#allocation15_spill] sm:$0xff] %v4122_v10 }
 0x169   : > { %v752_v27 = vpop.f32.mrf.mxu0  ;;  %v958_v37 = vpop.f32.mrf.mxu1  ;;  %4758 = vst [vmem:[#allocation5_spill] sm:$0xff] %v3978_v12  ;;  %v4765_v31 = vsel %vm3996_vm1, 4294967295, %v4764_v31  ;;  %vm3494_vm11 = vmneg %vm3996_vm1 }
 0x16a   : > { %v759_v41 = vadd.f32 %v752_v27, %v689_v34  ;;  %v828_v43 = vadd.f32 %v820_v15, %v758_v35  ;;  %v4761_v27 = vmov 0  ;;  %4766 = vst [vmem:[#allocation9_spill] sm:$0xff] %v4765_v31  ;;  %vm3499_vm12 = vmneg %vm3990_vm15 }
 0x16b   : > { %v754_v33 = vpop.f32.mrf.mxu0  ;;  %v960_v47 = vpop.f32.mrf.mxu1  ;;  %v4762_v27 = vsel %vm3990_vm15, 4294967295, %v4761_v27  ;;  %vm4011_vm13 = vmpackc.low %vm3494_vm11, %vm3494_vm11  ;;  %vm1115_vm11 = vcmask 130048  }
 0x16c   : > { %v760_v45 = vadd.f32 %v754_v33, %v690_v39  ;;  %v829_v50 = vadd.f32 %v822_v19, %v759_v41  ;;  %4763 = vst [vmem:[#allocation8_spill] sm:$0xff] %v4762_v27  ;;  %vm4019_vm14 = vmpackc.low %vm3499_vm12, %vm3499_vm12  ;;  %vm1922_vm12 = vcmask 261120  }
 0x16d   : > { %v888_v36 = vpop.f32.mrf.mxu0  ;;  %v962_v60 = vpop.f32.mrf.mxu1 }
 0x16e   : > { %v897_v46 = vadd.f32 %v888_v36, %v827_v40  ;;  %v830_v54 = vadd.f32 %v824_v28, %v760_v45  ;;  %v4767_v40 = vmov 0  ;;  %v4770_v45 = vmov 0 }
 0x16f   : > { %v890_v42 = vpop.f32.mrf.mxu0  ;;  %v964_v13 = vpop.f32.mrf.mxu1  ;;  %v4768_v40 = vsel %vm4011_vm13, 4294967295, %v4767_v40  ;;  %v4771_v45 = vsel %vm4019_vm14, 4294967295, %v4770_v45 }
 0x170   : > { %v898_v51 = vadd.f32 %v890_v42, %v828_v43  ;;  %v967_v55 = vadd.f32 %v958_v37, %v897_v46  ;;  %4769 = vst [vmem:[#allocation10_spill] sm:$0xff] %v4768_v40  ;;  %4772 = vst [vmem:[#allocation11_spill] sm:$0xff] %v4771_v45 }
 0x171   : > { %v892_v48 = vpop.f32.mrf.mxu0 }
 0x172   : > { %v899_v57 = vadd.f32 %v892_v48, %v829_v50  ;;  %v968_v63 = vadd.f32 %v960_v47, %v898_v51  ;;  %v3676_v48 = vld [vmem:[%s4670_s4] sm:$0xff]   ;;  %v3678_v50 = vld [vmem:[%s4670_s4 + $0x8] sm:$0xff]   ;;  %v1869_v51 = vld [vmem:[%s4671_s5 + $0x10] sm:$0xff] }
 0x173   : > { %v894_v52 = vpop.f32.mrf.mxu0 }
 0x174   : > { %v900_v1 = vadd.f32 %v894_v52, %v830_v54  ;;  %v969_v8 = vadd.f32 %v962_v60, %v899_v57  ;;  %v1870_v52 = vld [vmem:[%s4671_s5 + $0x18] sm:$0xff]  ;;  %v1868_v54 = vld [vmem:[%s4671_s5 + $0x8] sm:$0xff] }
 0x175   : > { %v1028_v61 = vpop.f32.mrf.mxu0 }
 0x176   : > { %v1037_v2 = vadd.f32 %v1028_v61, %v967_v55  ;;  %v970_v17 = vadd.f32 %v964_v13, %v900_v1  ;;  %v4070_v55 = vld.sshfl [vmem:[%s385_s26] sm:$0x33 pattern:$0x76325410]  ;;  %v4112_v1 = vld [vmem:[%s4670_s4 + $0x10] sm:$0xff]  }
 0x177   : > { %v1030_v5 = vpop.f32.mrf.mxu0  ;;  %4773 = vst [vmem:[#allocation12_spill] sm:$0xff] %v4070_v55  ;;  %v4088_v57 = vcombine.high %v4070_v55, %v4070_v55  ;;  %4780 = vst [vmem:[#allocation14_spill] sm:$0xff] %v4112_v1 }
 0x178   : > { %v1038_v9 = vadd.f32 %v1030_v5, %v968_v63  ;;  %v1053_v11 = vadd.f32 %v3970_v59, %v1037_v2 }
 0x179   : > { %v1032_v15 = vpop.f32.mrf.mxu0  ;;  %4779 = vst [vmem:[#allocation13_spill] sm:$0xff] %v4088_v57 }
 0x17a   : > { %v1054_v18 = vadd.f32 %v3970_v59, %v1038_v9  ;;  %v1057_v19 = vmax.f32 %v1053_v11, 0.0  ;;  %v1039_v21 = vadd.f32 %v1032_v15, %v969_v8  ;;  %v4127_v11 = vld [vmem:[%s4670_s4 + $0x30] sm:$0xff]  }
 0x17b   : > { %v1034_v23 = vpop.f32.mrf.mxu0  ;;  %4782 = vst [vmem:[#allocation16_spill] sm:$0xff] %v4127_v11 }
 0x17c   : > { %v1058_v24 = vmax.f32 %v1054_v18, 0.0  ;;  %v1055_v25 = vadd.f32 %v3978_v12, %v1039_v21  ;;  %v1040_v26 = vadd.f32 %v1034_v23, %v970_v17  ;;  %v1073_v28 = vmul.f32 %v3982_v14, %v1057_v19  ;;  %v4139_v19 = vld [vmem:[%s4670_s4 + $0x20] sm:$0xff]   ;;  %v4144_v21 = vld [vmem:[%s4670_s4 + $0x38] sm:$0xff]  }
 0x17d   : > { %4783 = vst [vmem:[#allocation17_spill] sm:$0xff] %v4139_v19  ;;  %4784 = vst [vmem:[#allocation18_spill] sm:$0xff] %v4144_v21 }
 0x17e   : > { %v1059_v29 = vmax.f32 %v1055_v25, 0.0  ;;  %v1056_v30 = vadd.f32 %v3978_v12, %v1040_v26  ;;  %v1074_v33 = vmul.f32 %v3987_v22, %v1058_v24  ;;  %v1081_v36 = vsel %vm3990_vm15, 0.0, %v1073_v28 }
 0x180   : > { %v1075_v34 = vmul.f32 %v3982_v14, %v1059_v29  ;;  %v1060_v35 = vmax.f32 %v1056_v30, 0.0  ;;  %v1082_v41 = vsel %vm3996_vm1, 0.0, %v1074_v33  ;;  %v4161_v29 = vld [vmem:[%s4670_s4 + $0x50] sm:$0xff]  }
 0x181   : > { %4786 = vst [vmem:[#allocation20_spill] sm:$0xff] %v4161_v29 }
 0x182   : > { %v1083_v37 = vsel %vm3990_vm15, 0.0, %v1075_v34  ;;  %v1076_v38 = vmul.f32 %v3987_v22, %v1060_v35  ;;  %v3502_v46 = vpack.c.bf16 %v1075_v34, %v1073_v28  ;;  %v4156_v28 = vld [vmem:[%s4670_s4 + $0x28] sm:$0xff]   ;;  %v4173_v34 = vld [vmem:[%s4670_s4 + $0x40] sm:$0xff]   ;;  %v4178_v35 = vld [vmem:[%s4670_s4 + $0x58] sm:$0xff]  }
 0x183   : > { %v1085_v39 = vpack.c.bf16 %v1083_v37, %v1081_v36  ;;  %4785 = vst [vmem:[#allocation19_spill] sm:$0xff] %v4156_v28  ;;  %4787 = vst [vmem:[#allocation21_spill] sm:$0xff] %v4173_v34 }
 0x184   : > { %v1084_v42 = vsel %vm3996_vm1, 0.0, %v1076_v38  ;;  %v3497_v43 = vpack.c.bf16 %v1076_v38, %v1074_v33  ;;  %4788 = vst [vmem:[#allocation22_spill] sm:$0xff] %v4178_v35  ;;  %v4190_v38 = vld [vmem:[%s4670_s4 + $0x48] sm:$0xff]  }
 0x185   : > { %v1086_v47 = vpack.c.bf16 %v1084_v42, %v1082_v41  ;;  %1108 = vrot.lane.b32.xlu1 %v1085_v39, %s3744_s27  ;;  %4789 = vst [vmem:[#allocation23_spill] sm:$0xff] %v4190_v38  ;;  %v4206_v41 = vld [vmem:[%s4670_s4 + $0x60] sm:$0xff]   ;;  %v4211_v42 = vld [vmem:[%s4670_s4 + $0x78] sm:$0xff]  }
 0x186   : > { %3498 = vmatprep.subr.msk.bf16.mxu0 %vm4011_vm13, %v3497_v43  ;;  %4791 = vst [vmem:[#allocation25_spill] sm:$0xff] %v4206_v41  ;;  %4792 = vst [vmem:[#allocation26_spill] sm:$0xff] %v4211_v42 }
 0x187   : > { %1110 = vrot.lane.b32.xlu0 %v1086_v47, %s3744_s27  ;;  %3503 = vmatpush1.bf16.msk.msra.mxu0 %vm4019_vm14, %v3502_v46 }
 0x189   : > { %1259 = vrot.lane.b32.xlu1 %v1085_v39, %s3745_s28 }
 0x18a   : > { %3504 = vmatmul.mubr.msk.bf16.vlgmr.msra.gmra.mxu0 %vm1115_vm11, %v3676_v48  ;;  %v4231_v48 = vld [vmem:[%s4670_s4 + $0x80] sm:$0xff]  }
 0x18b   : > { %1261 = vrot.lane.b32.xlu0 %v1086_v47, %s3745_s28  ;;  %1233 = vmatprep.mubr.bf16.mxu0 %v4689_v0  ;;  %4794 = vst [vmem:[#allocation28_spill] sm:$0xff] %v4231_v48 }
 0x18d   : > { %1348 = vrot.lane.b32.xlu1 %v1085_v39, %s4684_s16 }
 0x18f   : > { %1350 = vrot.lane.b32.xlu0 %v1086_v47, %s4684_s16  ;;  %s4778_s16 = smov 87  }
 0x191   : > { %1437 = vrot.lane.b32.xlu1 %v1085_v39, %s4678_s17 }
 0x192   : > { %3505 = vmatmul.mubr.msk.bf16.gmra.mxu0 %vm1115_vm11, %v3678_v50  ;;  %v4239_v50 = vld [vmem:[%s4670_s4 + $0x88] sm:$0xff]  }
 0x193   : > { %1439 = vrot.lane.b32.xlu0 %v1086_v47, %s4678_s17  ;;  %1393 = vmatprep.mubr.bf16.mxu0 %v4689_v0  ;;  %s4774_s17 = smov 108   ;;  %4795 = vst [vmem:[#allocation29_spill] sm:$0xff] %v4239_v50 }
 0x195   : > { %1526 = vrot.lane.b32.xlu1 %v1085_v39, %s4676_s18 }
 0x197   : > { %1528 = vrot.lane.b32.xlu0 %v1086_v47, %s4676_s18  ;;  %s4775_s18 = smov 107  }
 0x199   : > { %1615 = vrot.lane.b32.xlu1 %v1085_v39, %s4680_s19 }
 0x19b   : > { %1617 = vrot.lane.b32.xlu0 %v1086_v47, %s4680_s19 }
 0x19d   : > { %1704 = vrot.lane.b32.xlu1 %v1085_v39, %s4682_s21 }
 0x19f   : > { %1706 = vrot.lane.b32.xlu0 %v1086_v47, %s4682_s21 }
 0x1a1   : > { %1793 = vrot.lane.b32.xlu1 %v1085_v39, %s3751_s24  ;;  %v4195_v39 = vld [vmem:[%s4670_s4 + $0x70] sm:$0xff]  }
 0x1a2   : > { %4790 = vst [vmem:[#allocation24_spill] sm:$0xff] %v4195_v39 }
 0x1a3   : > { %1795 = vrot.lane.b32.xlu0 %v1086_v47, %s3751_s24  ;;  %v4223_v47 = vld [vmem:[%s4670_s4 + $0x68] sm:$0xff]  }
 0x1a4   : > { %4793 = vst [vmem:[#allocation27_spill] sm:$0xff] %v4223_v47 }
 0x1a5   : > { %1883 = vperm.xlu1 %3666, %v1869_v51  }
 0x1a7   : > { %1888 = vperm.xlu0 %3665, %v1870_v52  }
 0x1a9   : > { %1873 = vperm.xlu1 %3666, %v1867_v53  }
 0x1ab   : > { %1878 = vperm.xlu0 %3665, %v1868_v54  }
 0x1ad   : > { %1990 = vrot.lane.b32.xlu1 %v4070_v55, %s3744_s27 }
 0x1af   : > { %1992 = vrot.lane.b32.xlu0 %v4088_v57, %s3744_s27 }
 0x1b1   : > { %2093 = vrot.lane.b32.xlu1 %v4070_v55, %s3745_s28 }
 0x1b3   : > { %2095 = vrot.lane.b32.xlu0 %v4088_v57, %s3745_s28 }
 0x1b5   : > { %2151 = vrot.lane.b32.xlu1 %v4070_v55, %s4774_s17 }
 0x1b7   : > { %2153 = vrot.lane.b32.xlu0 %v4088_v57, %s4774_s17 }
 0x1b9   : > { %2209 = vrot.lane.b32.xlu1 %v4070_v55, %s4775_s18 }
 0x1bb   : > { %2211 = vrot.lane.b32.xlu0 %v4088_v57, %s4775_s18 }
 0x1bd   : > { %2267 = vrot.lane.b32.xlu1 %v4070_v55, %s4776_s22 }
 0x1bf   : > { %2269 = vrot.lane.b32.xlu0 %v4088_v57, %s4776_s22 }
 0x1c1   : > { %2325 = vrot.lane.b32.xlu1 %v4070_v55, %s4777_s23 }
 0x1c3   : > { %2327 = vrot.lane.b32.xlu0 %v4088_v57, %s4777_s23 }
 0x1c5   : > { %2383 = vrot.lane.b32.xlu1 %v4070_v55, %s4778_s16 }
 0x1c7   : > { %2385 = vrot.lane.b32.xlu0 %v4088_v57, %s4778_s16 }
 0x1c9   : > { %2441 = vrot.lane.b32.xlu1 %v4070_v55, %s3751_s24 }
 0x1cb   : > { %2443 = vrot.lane.b32.xlu0 %v4088_v57, %s3751_s24 }
 0x1f7   : > { %v1109_v60 = vpop.permute.xlu1 %1108 }
 0x1f9   : > { %v1111_v61 = vpop.permute.xlu0 %1110 }
 0x1fa   : > { %v1112_v63 = vsel %vm435_vm3, %v1109_v60, %v1111_v61  ;;  %1136 = vmatprep.subr.bf16.mxu1 %v1111_v61 }
 0x1fb   : > { %1137 = vmatpush1.bf16.msra.mxu1 %v1112_v63  ;;  %v1260_v2 = vpop.permute.xlu1 %1259 }
 0x1fd   : > { %v1262_v3 = vpop.permute.xlu0 %1261 }
 0x1fe   : > { %v1263_v5 = vsel %vm4740_vm4, %v1260_v2, %v1262_v3  ;;  %3490 = vmatmul.mubr.msk.bf16.vlgmr.msra.gmra.mxu1 %vm1115_vm11, %v4112_v1  ;;  %1286 = vmatprep.subr.bf16.mxu1 %v1262_v3 }
 0x1ff   : > { %1287 = vmatpush1.bf16.msra.mxu1 %v1263_v5  ;;  %v1349_v7 = vpop.permute.xlu1 %1348  ;;  %1164 = vmatprep.mubr.bf16.mxu1 %v4689_v0 }
 0x201   : > { %v1351_v8 = vpop.permute.xlu0 %1350 }
 0x202   : > { %v1352_v9 = vsel %vm4739_vm5, %v1349_v7, %v1351_v8  ;;  %1375 = vmatprep.subr.bf16.mxu0 %v1351_v8 }
 0x203   : > { %1376 = vmatpush1.bf16.msra.mxu0 %v1352_v9  ;;  %v1438_v13 = vpop.permute.xlu1 %1437 }
 0x205   : > { %v1440_v15 = vpop.permute.xlu0 %1439 }
 0x206   : > { %3491 = vmatmul.mubr.msk.bf16.gmra.mxu1 %vm1115_vm11, %v4122_v10  ;;  %3520 = vmatmul.mubr.msk.bf16.vlgmr.msra.gmra.mxu0 %vm1115_vm11, %v4127_v11  ;;  %v1441_v24 = vsel %vm4737_vm6, %v1438_v13, %v1440_v15 }
 0x207   : > { %1464 = vmatprep.subr.bf16.mxu1 %v1440_v15  ;;  %1304 = vmatprep.mubr.bf16.mxu1 %v4689_v0  ;;  %v1527_v16 = vpop.permute.xlu1 %1526 }
 0x208   : > { %1403 = vmatprep.mubr.bf16.mxu0 %v4689_v0 }
 0x209   : > { %v1529_v17 = vpop.permute.xlu0 %1528 }
 0x20a   : > { %v1530_v18 = vsel %vm4738_vm7, %v1527_v16, %v1529_v17  ;;  %1553 = vmatprep.subr.bf16.mxu0 %v1529_v17 }
 0x20b   : > { %1554 = vmatpush1.bf16.msra.mxu0 %v1530_v18  ;;  %v1616_v25 = vpop.permute.xlu1 %1615 }
 0x20d   : > { %v1618_v23 = vpop.permute.xlu0 %1617 }
 0x20e   : > { %3512 = vmatmul.mubr.msk.bf16.vlgmr.msra.gmra.mxu1 %vm1115_vm11, %v4139_v19  ;;  %3521 = vmatmul.mubr.msk.bf16.gmra.mxu0 %vm1115_vm11, %v4144_v21  ;;  %v1619_v36 = vsel %vm4735_vm8, %v1616_v25, %v1618_v23 }
 0x20f   : > { %1465 = vmatpush1.bf16.msra.mxu1 %v1441_v24  ;;  %1314 = vmatprep.mubr.bf16.mxu1 %v4689_v0  ;;  %v1705_v30 = vpop.permute.xlu1 %1704 }
 0x210   : > { %1642 = vmatprep.subr.bf16.mxu1 %v1618_v23  ;;  %1571 = vmatprep.mubr.bf16.mxu0 %v4689_v0 }
 0x211   : > { %v1707_v26 = vpop.permute.xlu0 %1706 }
 0x212   : > { %1731 = vmatprep.subr.bf16.mxu0 %v1707_v26  ;;  %v1708_v33 = vsel %vm4736_vm9, %v1705_v30, %v1707_v26 }
 0x213   : > { %v1794_v43 = vpop.permute.xlu1 %1793 }
 0x215   : > { %v1796_v37 = vpop.permute.xlu0 %1795 }
 0x216   : > { %3513 = vmatmul.mubr.msk.bf16.gmra.mxu1 %vm1115_vm11, %v4156_v28  ;;  %3536 = vmatmul.mubr.msk.bf16.vlgmr.msra.gmra.mxu0 %vm1115_vm11, %v4161_v29  ;;  %v1797_v46 = vsel %vm4734_vm10, %v1794_v43, %v1796_v37 }
 0x217   : > { %1732 = vmatpush1.bf16.msra.mxu0 %v1708_v33  ;;  %1482 = vmatprep.mubr.bf16.mxu1 %v4689_v0 }
 0x218   : > { %1581 = vmatprep.mubr.bf16.mxu0 %v4689_v0 }
 0x21e   : > { %3528 = vmatmul.mubr.msk.bf16.vlgmr.msra.gmra.mxu1 %vm1115_vm11, %v4173_v34  ;;  %3537 = vmatmul.mubr.msk.bf16.gmra.mxu0 %vm1115_vm11, %v4178_v35 }
 0x21f   : > { %1643 = vmatpush1.bf16.msra.mxu1 %v1619_v36  ;;  %1492 = vmatprep.mubr.bf16.mxu1 %v4689_v0 }
 0x220   : > { %1820 = vmatprep.subr.bf16.mxu1 %v1796_v37  ;;  %1749 = vmatprep.mubr.bf16.mxu0 %v4689_v0  ;;  %v4246_v52 = vpop.permute.xlu1 %1883 }
 0x221   : > { %4797 = vst [vmem:[#allocation31_spill] sm:$0xff] %v4246_v52 }
 0x222   : > { %v4244_v51 = vpop.permute.xlu0 %1888 }
 0x223   : > { %4796 = vst [vmem:[#allocation30_spill] sm:$0xff] %v4244_v51 }
 0x224   : > { %v4250_v54 = vpop.permute.xlu1 %1873 }
 0x225   : > { %4799 = vst [vmem:[#allocation33_spill] sm:$0xff] %v4250_v54 }
 0x226   : > { %3529 = vmatmul.mubr.msk.bf16.gmra.mxu1 %vm1115_vm11, %v4190_v38  ;;  %3552 = vmatmul.mubr.msk.bf16.vlgmr.msra.gmra.mxu0 %vm1115_vm11, %v4195_v39  ;;  %v4248_v53 = vpop.permute.xlu0 %1878 }
 0x227   : > { %1660 = vmatprep.mubr.bf16.mxu1 %v4689_v0  ;;  %1759 = vmatprep.mubr.bf16.mxu0 %v4689_v0  ;;  %4798 = vst [vmem:[#allocation32_spill] sm:$0xff] %v4248_v53 }
 0x228   : > { %v1991_v63 = vpop.permute.xlu1 %1990 }
 0x22a   : > { %v1993_v60 = vpop.permute.xlu0 %1992 }
 0x22b   : > { %v1999_v61 = vand.u32 %v1993_v60, %v3856_v4  ;;  %v1994_v2 = vsel %vm435_vm3, %v1991_v63, %v1993_v60 }
 0x22c   : > { %v1996_v3 = vand.u32 %v1994_v2, %v3856_v4  ;;  %v2094_v8 = vpop.permute.xlu1 %2093 }
 0x22e   : > { %3544 = vmatmul.mubr.msk.bf16.vlgmr.msra.gmra.mxu1 %vm1115_vm11, %v4206_v41  ;;  %3553 = vmatmul.mubr.msk.bf16.gmra.mxu0 %vm1115_vm11, %v4211_v42  ;;  %v2096_v5 = vpop.permute.xlu0 %2095 }
 0x22f   : > { %1821 = vmatpush1.bf16.msra.mxu1 %v1797_v46  ;;  %1670 = vmatprep.mubr.bf16.mxu1 %v4689_v0  ;;  %v2102_v7 = vand.u32 %v2096_v5, %v3856_v4  ;;  %v2097_v9 = vsel %vm4740_vm4, %v2094_v8, %v2096_v5 }
 0x230   : > { %1961 = vmatprep.mubr.bf16.mxu0 %v4689_v0  ;;  %2015 = vmatprep.subr.bf16.mxu1 %v1999_v61  ;;  %v2099_v13 = vand.u32 %v2097_v9, %v3856_v4  ;;  %v2152_v16 = vpop.permute.xlu1 %2151 }
 0x232   : > { %v4261_v15 = vpop.permute.xlu0 %2153 }
 0x233   : > { %4800 = vst [vmem:[#allocation34_spill] sm:$0xff] %v4261_v15  ;;  %v4265_v17 = vsel %vm4739_vm5, %v2152_v16, %v4261_v15 }
 0x234   : > { %4801 = vst [vmem:[#allocation35_spill] sm:$0xff] %v4265_v17  ;;  %v2210_v24 = vpop.permute.xlu1 %2209 }
 0x236   : > { %3545 = vmatmul.mubr.msk.bf16.gmra.mxu1 %vm1115_vm11, %v4223_v47  ;;  %v2212_v23 = vpop.permute.xlu0 %2211 }
 0x237   : > { %1838 = vmatprep.mubr.bf16.mxu1 %v4689_v0  ;;  %v2218_v25 = vand.u32 %v2212_v23, %v3856_v4 }
 0x238   : > { %v2268_v36 = vpop.permute.xlu1 %2267 }
 0x23a   : > { %v4277_v33 = vpop.permute.xlu0 %2269 }
 0x23b   : > { %4802 = vst [vmem:[#allocation36_spill] sm:$0xff] %v4277_v33 }
 0x23c   : > { %v2326_v46 = vpop.permute.xlu1 %2325 }
 0x23e   : > { %3560 = vmatmul.mubr.msk.bf16.vlgmr.msra.gmra.mxu1 %vm1115_vm11, %v4231_v48  ;;  %v2328_v43 = vpop.permute.xlu0 %2327 }
 0x23f   : > { %1848 = vmatprep.mubr.bf16.mxu1 %v4689_v0  ;;  %2016 = vmatpush1.bf16.msra.mxu1 %v1996_v3  ;;  %v2334_v60 = vand.u32 %v2328_v43, %v3856_v4  ;;  %v2329_v61 = vsel %vm4735_vm8, %v2326_v46, %v2328_v43 }
 0x240   : > { %2118 = vmatprep.subr.bf16.mxu1 %v2102_v7  ;;  %v2331_v63 = vand.u32 %v2329_v61, %v3856_v4  ;;  %v2384_v5 = vpop.permute.xlu1 %2383 }
 0x242   : > { %v4293_v3 = vpop.permute.xlu0 %2385 }
 0x243   : > { %4804 = vst [vmem:[#allocation38_spill] sm:$0xff] %v4293_v3 }
 0x244   : > { %v2442_v9 = vpop.permute.xlu1 %2441 }
 0x246   : > { %3561 = vmatmul.mubr.msk.bf16.gmra.mxu1 %vm1115_vm11, %v4239_v50  ;;  %v2444_v8 = vpop.permute.xlu0 %2443 }
 0x247   : > { %2033 = vmatprep.mubr.bf16.mxu1 %v4689_v0  ;;  %v2445_v16 = vsel %vm4734_vm10, %v2442_v9, %v2444_v8 }
 0x24a   : > { %v4267_v18 = vpop.f32.mrf.mxu0 }
 0x24c   : > { %v4275_v30 = vpop.f32.mrf.mxu0 }
 0x24e   : > { %3567 = vmatmul.mubr.msk.bf16.vlgmr.msra.gmra.mxu1 %vm437_vm2, %v3895_v20  ;;  %v2213_v20 = vsel %vm4737_vm6, %v2210_v24, %v2212_v23  ;;  %v4283_v37 = vpop.f32.mrf.mxu0  ;;  %v2447_v23 = vand.u32 %v2445_v16, %v3856_v4 }
 0x24f   : > { %2119 = vmatpush1.bf16.msra.mxu1 %v2099_v13  ;;  %2136 = vmatprep.mubr.bf16.mxu1 %v4689_v0  ;;  %v2215_v26 = vand.u32 %v2213_v20, %v3856_v4  ;;  %v2450_v13 = vand.u32 %v2444_v8, %v3856_v4 }
 0x250   : > { %2234 = vmatprep.subr.bf16.mxu1 %v2218_v25  ;;  %v4291_v2 = vpop.f32.mrf.mxu0 }
 0x252   : > { %v4299_v7 = vpop.f32.mrf.mxu0 }
 0x254   : > { %v1237_v24 = vpop.f32.mrf.mxu0 }
 0x256   : > { %3569 = vmatmul.mubr.msk.bf16.vlgmr.msra.gmra.mxu1 %vm437_vm2, %v3912_v32  ;;  %v4281_v32 = vsel %vm4738_vm7, %v2268_v36, %v4277_v33 }
 0x257   : > { %2252 = vmatprep.mubr.bf16.mxu1 %v4689_v0  ;;  %2235 = vmatpush1.bf16.msra.mxu1 %v2215_v26  ;;  %4803 = vst [vmem:[#allocation37_spill] sm:$0xff] %v4281_v32  ;;  %v1239_v26 = vpop.f32.mrf.mxu0 }
 0x258   : > { %2350 = vmatprep.subr.bf16.mxu1 %v2334_v60 }
 0x259   : > { %v4310_v43 = vpop.f32.mrf.mxu0 }
 0x25e   : > { %3571 = vmatmul.mubr.msk.bf16.vlgmr.msra.gmra.mxu1 %vm437_vm2, %v3931_v44  ;;  %v4297_v44 = vsel %vm4736_vm9, %v2384_v5, %v4293_v3 }
 0x25f   : > { %2368 = vmatprep.mubr.bf16.mxu1 %v4689_v0  ;;  %2351 = vmatpush1.bf16.msra.mxu1 %v2331_v63  ;;  %4805 = vst [vmem:[#allocation39_spill] sm:$0xff] %v4297_v44 }
 0x260   : > { %2466 = vmatprep.subr.bf16.mxu1 %v2450_v13 }
 0x266   : > { %3573 = vmatmul.mubr.msk.bf16.vlgmr.msra.gmra.mxu1 %vm437_vm2, %v3950_v56 }
 0x267   : > { %2484 = vmatprep.mubr.bf16.mxu1 %v4689_v0  ;;  %2467 = vmatpush1.bf16.msra.mxu1 %v2447_v23 }
 0x26e   : > { %3575 = vmatmul.mubr.msk.bf16.vlgmr.msra.gmra.mxu1 %vm437_vm2, %v3961_v58 }
 0x26f   : > { %2611 = vmatprep.mubr.bf16.mxu1 %v4689_v0 }
 0x2be   : > { %v1156_v25 = vpop.f32.mrf.mxu1 }
 0x2bf   : > { %v1226_v14 = vadd.f32 %v4267_v18, %v1156_v25 }
 0x2c0   : > { %v1158_v20 = vpop.f32.mrf.mxu1 }
 0x2c1   : > { %v1228_v18 = vadd.f32 %v4275_v30, %v1158_v20 }
 0x2c2   : > { %v1160_v56 = vpop.f32.mrf.mxu1 }
 0x2c3   : > { %v1230_v3 = vadd.f32 %v4283_v37, %v1160_v56 }
 0x2c4   : > { %v1162_v36 = vpop.f32.mrf.mxu1 }
 0x2c5   : > { %v1232_v4 = vadd.f32 %v4291_v2, %v1162_v36 }
 0x2c6   : > { %v1166_v46 = vpop.f32.mrf.mxu1  ;;  %v1395_v60 = vpop.f32.mrf.mxu0 }
 0x2c8   : > { %v1168_v61 = vpop.f32.mrf.mxu1  ;;  %v4312_v63 = vpop.f32.mrf.mxu0 }
 0x2c9   : > { %v1238_v53 = vadd.f32 %v1237_v24, %v1168_v61 }
 0x2ca   : > { %v1170_v5 = vpop.f32.mrf.mxu1  ;;  %v1399_v8 = vpop.f32.mrf.mxu0 }
 0x2cb   : > { %v1240_v37 = vadd.f32 %v1239_v26, %v1170_v5 }
 0x2cc   : > { %v1172_v9 = vpop.f32.mrf.mxu1  ;;  %v1401_v13 = vpop.f32.mrf.mxu0 }
 0x2ce   : > { %v1306_v16 = vpop.f32.mrf.mxu1  ;;  %v4314_v23 = vpop.f32.mrf.mxu0 }
 0x2cf   : > { %v1325_v49 = vadd.f32 %v1306_v16, %v1226_v14  ;;  %v1236_v14 = vadd.f32 %v4299_v7, %v1166_v46 }
 0x2d0   : > { %v1308_v6 = vpop.f32.mrf.mxu1  ;;  %v1407_v58 = vpop.f32.mrf.mxu0 }
 0x2d1   : > { %v1414_v17 = vadd.f32 %v1395_v60, %v1325_v49  ;;  %v1326_v49 = vadd.f32 %v1308_v6, %v1228_v18 }
 0x2d2   : > { %v1310_v62 = vpop.f32.mrf.mxu1  ;;  %v4316_v50 = vpop.f32.mrf.mxu0 }
 0x2d3   : > { %v1327_v15 = vadd.f32 %v1310_v62, %v1230_v3 }
 0x2d4   : > { %v1312_v0 = vpop.f32.mrf.mxu1  ;;  %v4318_v48 = vpop.f32.mrf.mxu0 }
 0x2d5   : > { %v1328_v25 = vadd.f32 %v1312_v0, %v1232_v4  ;;  %v1415_v0 = vadd.f32 %v4312_v63, %v1326_v49 }
 0x2d6   : > { %v1316_v47 = vpop.f32.mrf.mxu1  ;;  %v1573_v42 = vpop.f32.mrf.mxu0 }
 0x2d7   : > { %v1329_v62 = vadd.f32 %v1316_v47, %v1236_v14  ;;  %v1417_v24 = vadd.f32 %v1401_v13, %v1328_v25 }
 0x2d8   : > { %v1318_v41 = vpop.f32.mrf.mxu1  ;;  %v4320_v39 = vpop.f32.mrf.mxu0 }
 0x2d9   : > { %v1330_v56 = vadd.f32 %v1318_v41, %v1238_v53  ;;  %v1418_v4 = vadd.f32 %v4314_v23, %v1329_v62 }
 0x2da   : > { %v1320_v38 = vpop.f32.mrf.mxu1  ;;  %v1577_v35 = vpop.f32.mrf.mxu0 }
 0x2db   : > { %v1331_v2 = vadd.f32 %v1320_v38, %v1240_v37  ;;  %v1419_v60 = vadd.f32 %v1407_v58, %v1330_v56 }
 0x2dc   : > { %v1322_v34 = vpop.f32.mrf.mxu1  ;;  %v4322_v29 = vpop.f32.mrf.mxu0 }
 0x2dd   : > { %v1420_v6 = vadd.f32 %v4316_v50, %v1331_v2 }
 0x2de   : > { %v1484_v28 = vpop.f32.mrf.mxu1  ;;  %v4324_v21 = vpop.f32.mrf.mxu0 }
 0x2df   : > { %v1503_v57 = vadd.f32 %v1484_v28, %v1414_v17  ;;  %v1242_v17 = vadd.f32 %v4310_v43, %v1172_v9 }
 0x2e0   : > { %v1486_v19 = vpop.f32.mrf.mxu1  ;;  %v4326_v11 = vpop.f32.mrf.mxu0 }
 0x2e1   : > { %v1592_v54 = vadd.f32 %v1573_v42, %v1503_v57  ;;  %v1332_v30 = vadd.f32 %v1322_v34, %v1242_v17  ;;  %v1504_v53 = vadd.f32 %v1486_v19, %v1415_v0 }
 0x2e2   : > { %v1488_v10 = vpop.f32.mrf.mxu1  ;;  %v4328_v45 = vpop.f32.mrf.mxu0 }
 0x2e3   : > { %v1593_v50 = vadd.f32 %v4320_v39, %v1504_v53 }
 0x2e4   : > { %v1490_v1 = vpop.f32.mrf.mxu1  ;;  %v4330_v27 = vpop.f32.mrf.mxu0 }
 0x2e5   : > { %4806 = vst [vmem:[#allocation40_spill] sm:$0xff] %v4330_v27  ;;  %v1416_v27 = vadd.f32 %v1399_v8, %v1327_v15  ;;  %v1506_v41 = vadd.f32 %v1490_v1, %v1417_v24 }
 0x2e6   : > { %v1494_v40 = vpop.f32.mrf.mxu1  ;;  %v1751_v59 = vpop.f32.mrf.mxu0 }
 0x2e7   : > { %v1507_v38 = vadd.f32 %v1494_v40, %v1418_v4 }
 0x2e8   : > { %v1496_v31 = vpop.f32.mrf.mxu1  ;;  %v4334_v33 = vpop.f32.mrf.mxu0 }
 0x2e9   : > { %4807 = vst [vmem:[#allocation41_spill] sm:$0xff] %v4334_v33  ;;  %v1505_v33 = vadd.f32 %v1488_v10, %v1416_v27  ;;  %v1508_v10 = vadd.f32 %v1496_v31, %v1419_v60  ;;  %v4812_v60 = vld [vmem:[#allocation31_spill] sm:$0xff] }
 0x2ea   : > { %v1498_v22 = vpop.f32.mrf.mxu1  ;;  %v1755_v52 = vpop.f32.mrf.mxu0 }
 0x2eb   : > { %v1594_v20 = vadd.f32 %v1577_v35, %v1505_v33  ;;  %v1509_v7 = vadd.f32 %v1498_v22, %v1420_v6  ;;  %v1595_v35 = vadd.f32 %v4322_v29, %v1506_v41  ;;  %v1597_v1 = vadd.f32 %v4326_v11, %v1508_v10 }
 0x2ec   : > { %v1500_v12 = vpop.f32.mrf.mxu1  ;;  %v1757_v3 = vpop.f32.mrf.mxu0  ;;  %v4809_v9 = vld [vmem:[#allocation40_spill] sm:$0xff] }
 0x2ed   : > { %v1598_v40 = vadd.f32 %v4328_v45, %v1509_v7 }
 0x2ee   : > { %v1662_v44 = vpop.f32.mrf.mxu1  ;;  %v1761_v57 = vpop.f32.mrf.mxu0 }
 0x2ef   : > { %v1681_v36 = vadd.f32 %v1662_v44, %v1592_v54  ;;  %v1421_v44 = vadd.f32 %v4318_v48, %v1332_v30  ;;  %v4808_v48 = vld [vmem:[#allocation33_spill] sm:$0xff] }
 0x2f0   : > { %v1664_v32 = vpop.f32.mrf.mxu1  ;;  %v1763_v33 = vpop.f32.mrf.mxu0  ;;  %v4811_v45 = vld [vmem:[#allocation41_spill] sm:$0xff] }
 0x2f1   : > { %v1770_v42 = vadd.f32 %v1751_v59, %v1681_v36  ;;  %v1510_v43 = vadd.f32 %v1500_v12, %v1421_v44  ;;  %v1596_v59 = vadd.f32 %v4324_v21, %v1507_v38  ;;  %v1682_v63 = vadd.f32 %v1664_v32, %v1593_v50 }
 0x2f2   : > { %v1666_v55 = vpop.f32.mrf.mxu1  ;;  %v1765_v5 = vpop.f32.mrf.mxu0 }
 0x2f3   : > { %v1683_v47 = vadd.f32 %v1666_v55, %v1594_v20  ;;  %v1599_v11 = vadd.f32 %v4809_v9, %v1510_v43  ;;  %v1771_v14 = vadd.f32 %v4811_v45, %v1682_v63  ;;  %v4813_v20 = vld [vmem:[#allocation30_spill] sm:$0xff]  ;;  %v4823_v63 = vld [vmem:[#allocation37_spill] sm:$0xff] }
 0x2f4   : > { %v1668_v51 = vpop.f32.mrf.mxu1  ;;  %v1767_v37 = vpop.f32.mrf.mxu0  ;;  %v3697_v9 = vld [vmem:[%s4668_s2 + $0x18] sm:$0xff]  }
 0x2f5   : > { %v1772_v46 = vadd.f32 %v1755_v52, %v1683_v47  ;;  %v1684_v31 = vadd.f32 %v1668_v51, %v1595_v35  ;;  %v4810_v52 = vld [vmem:[#allocation32_spill] sm:$0xff]  ;;  %v4815_v35 = vld [vmem:[#allocation13_spill] sm:$0xff] }
 0x2f6   : > { %v1672_v16 = vpop.f32.mrf.mxu1 }
 0x2f7   : > { %v1685_v29 = vadd.f32 %v1672_v16, %v1596_v59  ;;  %v1773_v39 = vadd.f32 %v1757_v3, %v1684_v31  ;;  %v4819_v59 = vmov 0   ;;  %v4376_v31 = vld [vmem:[%s4672_s6 + $0x8] ss:$0 sps:$4 sm:$0x33]  }
 0x2f8   : > { %v1674_v28 = vpop.f32.mrf.mxu1  ;;  %4820 = vst [vmem:[#allocation41_spill] sm:$0xff] %v4376_v31 }
 0x2f9   : > { %v1686_v19 = vadd.f32 %v1674_v28, %v1597_v1  ;;  %v1774_v25 = vadd.f32 %v1761_v57, %v1685_v29  ;;  %v4817_v1 = vld [vmem:[#allocation12_spill] sm:$0xff] }
 0x2fa   : > { %v1676_v15 = vpop.f32.mrf.mxu1 }
 0x2fb   : > { %v1687_v12 = vadd.f32 %v1676_v15, %v1598_v40  ;;  %v1775_v21 = vadd.f32 %v1763_v33, %v1686_v19  ;;  %v4822_v19 = vld [vmem:[#allocation36_spill] sm:$0xff] }
 0x2fc   : > { %v1678_v27 = vpop.f32.mrf.mxu1 }
 0x2fd   : > { %v1688_v51 = vadd.f32 %v1678_v27, %v1599_v11  ;;  %v1776_v32 = vadd.f32 %v1765_v5, %v1687_v12  ;;  %v4824_v5 = vld [vmem:[#allocation38_spill] sm:$0xff]  ;;  %v4825_v11 = vld [vmem:[#allocation39_spill] sm:$0xff] }
 0x2fe   : > { %v1840_v54 = vpop.f32.mrf.mxu1 }
 0x2ff   : > { %v1859_v34 = vadd.f32 %v1840_v54, %v1770_v42  ;;  %v1777_v2 = vadd.f32 %v1767_v37, %v1688_v51 }
 0x300   : > { %v1842_v26 = vpop.f32.mrf.mxu1 }
 0x301   : > { %v1891_v22 = vadd.f32 %v4808_v48, %v1859_v34  ;;  %v1860_v36 = vadd.f32 %v1842_v26, %v1771_v14  ;;  %v4814_v34 = vld [vmem:[#allocation2_spill] sm:$0xff] }
 0x302   : > { %v1844_v55 = vpop.f32.mrf.mxu1  ;;  %v2048_v33 = vand.u32 %v4815_v35, %v4814_v34  ;;  %v4364_v26 = vld [vmem:[%s4672_s6] sm:$0xff]   ;;  %v2045_v43 = vand.u32 %v4817_v1, %v4814_v34  ;;  %v2273_v29 = vand.u32 %v4823_v63, %v4814_v34  ;;  %v2389_v12 = vand.u32 %v4825_v11, %v4814_v34 }
 0x303   : > { %v1861_v61 = vadd.f32 %v1844_v55, %v1772_v46  ;;  %v1899_v58 = vmax.f32 %v1891_v22, 0.0  ;;  %v1892_v57 = vadd.f32 %v4808_v48, %v1860_v36  ;;  %4816 = vst [vmem:[#allocation40_spill] sm:$0xff] %v4364_v26  ;;  %v4818_v46 = vld [vmem:[#allocation34_spill] sm:$0xff]  ;;  %v4821_v55 = vld [vmem:[#allocation35_spill] sm:$0xff]  ;;  %v2276_v22 = vand.u32 %v4822_v19, %v4814_v34 }
 0x304   : > { %v1846_v8 = vpop.f32.mrf.mxu1  ;;  %v2160_v50 = vand.u32 %v4818_v46, %v4814_v34  ;;  %v2157_v40 = vand.u32 %v4821_v55, %v4814_v34 }
 0x305   : > { %v1893_v13 = vadd.f32 %v4810_v52, %v1861_v61  ;;  %v1862_v49 = vadd.f32 %v1846_v8, %v1773_v39  ;;  %v1900_v38 = vmax.f32 %v1892_v57, 0.0  ;;  %v3696_v61 = vld [vmem:[%s4668_s2] sm:$0xff]   ;;  %v2392_v8 = vand.u32 %v4824_v5, %v4814_v34  ;;  %v3699_v39 = vld [vmem:[%s4668_s2 + $0x38] sm:$0xff]  }
 0x306   : > { %v1850_v23 = vpop.f32.mrf.mxu1 }
 0x307   : > { %v1901_v18 = vmax.f32 %v1893_v13, 0.0  ;;  %v1863_v28 = vadd.f32 %v1850_v23, %v1774_v25  ;;  %v1894_v15 = vadd.f32 %v4810_v52, %v1862_v49  ;;  %v3698_v13 = vld [vmem:[%s4668_s2 + $0x28] sm:$0xff]  }
 0x308   : > { %v1852_v56 = vpop.f32.mrf.mxu1 }
 0x309   : > { %v1907_v16 = vpack.c.bf16 %v1901_v18, %v1899_v58  ;;  %v1864_v62 = vadd.f32 %v1852_v56, %v1775_v21  ;;  %v1895_v41 = vadd.f32 %v4812_v60, %v1863_v28  ;;  %v1902_v10 = vmax.f32 %v1894_v15, 0.0 }
 0x30a   : > { %v1854_v17 = vpop.f32.mrf.mxu1 }
 0x30b   : > { %v1865_v24 = vadd.f32 %v1854_v17, %v1776_v32  ;;  %v1896_v30 = vadd.f32 %v4812_v60, %v1864_v62  ;;  %v1903_v53 = vmax.f32 %v1895_v41, 0.0  ;;  %v1908_v7 = vpack.c.bf16 %v1902_v10, %v1900_v38 }
 0x30c   : > { %v1856_v3 = vpop.f32.mrf.mxu1 }
 0x30d   : > { %v1897_v0 = vadd.f32 %v4813_v20, %v1865_v24  ;;  %v1866_v4 = vadd.f32 %v1856_v3, %v1777_v2  ;;  %v1904_v42 = vmax.f32 %v1896_v30, 0.0 }
 0x30e   : > { %v2035_v23 = vpop.f32.mrf.mxu1 }
 0x30f   : > { %v1898_v27 = vadd.f32 %v4813_v20, %v1866_v4  ;;  %v1905_v6 = vmax.f32 %v1897_v0, 0.0 }
 0x310   : > { %v2037_v21 = vpop.f32.mrf.mxu1 }
 0x311   : > { %v1906_v47 = vmax.f32 %v1898_v27, 0.0  ;;  %v1909_v44 = vpack.c.bf16 %v1905_v6, %v1903_v53 }
 0x312   : > { %v2039_v51 = vpop.f32.mrf.mxu1 }
 0x313   : > { %v1910_v54 = vpack.c.bf16 %v1906_v47, %v1904_v42 }
 0x314   : > { %v2041_v58 = vpop.f32.mrf.mxu1 }
 0x315   : > { %1941 = vmatprep.subr.bf16.mxu0 %v1910_v54 }
 0x316   : > { %1942 = vmatpush1.bf16.msra.mxu0 %v1909_v44  ;;  %v2138_v18 = vpop.f32.mrf.mxu1 }
 0x317   : > { %1943 = vmatprep.subr.bf16.mxu0 %v1908_v7 }
 0x318   : > { %v2140_v45 = vpop.f32.mrf.mxu1 }
 0x31a   : > { %1944 = vmatpush1.bf16.msra.mxu0 %v1907_v16  ;;  %v4411_v14 = vpop.f32.mrf.mxu1 }
 0x31b   : > { %2064 = vmatprep.subr.bf16.mxu0 %v2048_v33 }
 0x31c   : > { %v4413_v37 = vpop.f32.mrf.mxu1 }
 0x31d   : > { %3564 = vmatmul.mubr.msk.bf16.vlgmr.msra.gmra.mxu0 %vm1922_vm12, %v4364_v26 }
 0x31e   : > { %1971 = vmatprep.mubr.bf16.mxu0 %v4819_v59  ;;  %2065 = vmatpush1.bf16.msra.mxu0 %v2045_v43  ;;  %v4419_v16 = vpop.f32.mrf.mxu1 }
 0x31f   : > { %2176 = vmatprep.subr.bf16.mxu0 %v2160_v50 }
 0x320   : > { %v4421_v28 = vpop.f32.mrf.mxu1 }
 0x322   : > { %v4428_v4 = vpop.f32.mrf.mxu1 }
 0x324   : > { %v4431_v53 = vpop.f32.mrf.mxu1 }
 0x325   : > { %3565 = vmatmul.mubr.msk.bf16.gmra.mxu0 %vm1922_vm12, %v4376_v31 }
 0x326   : > { %2082 = vmatprep.mubr.bf16.mxu0 %v4819_v59  ;;  %v4433_v33 = vpop.f32.mrf.mxu1 }
 0x32d   : > { %3568 = vmatmul.mubr.msk.bf16.vlgmr.msra.gmra.mxu0 %vm437_vm2, %v3696_v61 }
 0x32e   : > { %2177 = vmatpush1.bf16.msra.mxu0 %v2157_v40  ;;  %2194 = vmatprep.mubr.bf16.mxu0 %v4819_v59  ;;  %v4826_v40 = vld [vmem:[#allocation3_spill] sm:$0xff] }
 0x32f   : > { %2292 = vmatprep.subr.bf16.mxu0 %v2276_v22  ;;  %v4436_v19 = vadd.s32 16, %v4826_v40  ;;  %v4439_v5 = vadd.s32 8, %v4826_v40 }
 0x331   : > { %4827 = vst [vmem:[#allocation2_spill] sm:$0xff] %v4436_v19  ;;  %4828 = vst [vmem:[#allocation13_spill] sm:$0xff] %v4439_v5 }
 0x335   : > { %3570 = vmatmul.mubr.msk.bf16.vlgmr.msra.gmra.mxu0 %vm437_vm2, %v3697_v9 }
 0x336   : > { %2293 = vmatpush1.bf16.msra.mxu0 %v2273_v29  ;;  %2310 = vmatprep.mubr.bf16.mxu0 %v4819_v59  ;;  %v2372_v29 = vpop.f32.mrf.mxu1 }
 0x337   : > { %2408 = vmatprep.subr.bf16.mxu0 %v2392_v8 }
 0x33d   : > { %3572 = vmatmul.mubr.msk.bf16.vlgmr.msra.gmra.mxu0 %vm437_vm2, %v3698_v13 }
 0x33e   : > { %2409 = vmatpush1.bf16.msra.mxu0 %v2389_v12  ;;  %2426 = vmatprep.mubr.bf16.mxu0 %v4819_v59 }
 0x345   : > { %3574 = vmatmul.mubr.msk.bf16.vlgmr.msra.gmra.mxu0 %vm437_vm2, %v3699_v39  ;;  %vm3183_vm2 = vcmask 1042432  }
 0x346   : > { %2558 = vmatprep.mubr.bf16.mxu0 %v4819_v59 }
 0x3dd   : > { %v1963_v25 = vpop.f32.mrf.mxu0 }
 0x3df   : > { %v4415_v56 = vpop.f32.mrf.mxu0 }
 0x3e0   : > { %v3193_v24 = vsel %vm1922_vm12, %v4415_v56, -inf }
 0x3e1   : > { %v4417_v32 = vpop.f32.mrf.mxu0 }
 0x3e3   : > { %v1969_v49 = vpop.f32.mrf.mxu0 }
 0x3e4   : > { %v3194_v41 = vsel %vm1922_vm12, %v1969_v49, -inf }
 0x3e5   : > { %v1973_v62 = vpop.f32.mrf.mxu0 }
 0x3e6   : > { %v3184_v17 = vsel %vm3183_vm2, %v1973_v62, -inf }
 0x3e7   : > { %v3185_v2 = vmax.f32 %v1963_v25, %v3184_v17  ;;  %v1975_v36 = vpop.f32.mrf.mxu0 }
 0x3e8   : > { %v3196_v3 = vsel %vm3195_vm0, %v1975_v36, -inf }
 0x3e9   : > { %v3186_v15 = vmax.f32 %v3185_v2, %v4417_v32  ;;  %v3197_v30 = vmax.f32 %v3193_v24, %v3196_v3  ;;  %v1977_v0 = vpop.f32.mrf.mxu0 }
 0x3eb   : > { %v3187_v57 = vrot.slane %v3186_v15, 4  ;;  %v3198_v27 = vmax.f32 %v3197_v30, %v3194_v41  ;;  %v1978_v6 = vpop.f32.mrf.mxu0 }
 0x3ed   : > { %v3188_v10 = vmax.f32 %v3186_v15, %v3187_v57  ;;  %v3199_v42 = vrot.slane %v3198_v27, 4  ;;  %v2084_v47 = vpop.f32.mrf.mxu0 }
 0x3ee   : > { %v2085_v1 = vadd.f32 %v2084_v47, %v2035_v23 }
 0x3ef   : > { %v3189_v38 = vrot.slane %v3188_v10, 2  ;;  %v3200_v54 = vmax.f32 %v3198_v27, %v3199_v42  ;;  %v2086_v44 = vpop.f32.mrf.mxu0 }
 0x3f0   : > { %v2087_v43 = vadd.f32 %v2086_v44, %v2037_v21  ;;  %v2147_v9 = vadd.f32 %v2138_v18, %v2085_v1  ;;  %v2374_v18 = vpop.f32.mrf.mxu1 }
 0x3f1   : > { %v3190_v7 = vmax.f32 %v3188_v10, %v3189_v38  ;;  %v3201_v34 = vrot.slane %v3200_v54, 2  ;;  %v2088_v35 = vpop.f32.mrf.mxu0 }
 0x3f2   : > { %v2089_v8 = vadd.f32 %v2088_v35, %v2039_v51  ;;  %v2148_v11 = vadd.f32 %v2140_v45, %v2087_v43  ;;  %v2376_v27 = vpop.f32.mrf.mxu1 }
 0x3f3   : > { %v3191_v46 = vrot.slane %v3190_v7, 1  ;;  %v3202_v50 = vmax.f32 %v3200_v54, %v3201_v34  ;;  %v2090_v55 = vpop.f32.mrf.mxu0 }
 0x3f4   : > { %v2091_v21 = vadd.f32 %v2090_v55, %v2041_v58  ;;  %v2149_v15 = vadd.f32 %v4411_v14, %v2089_v8 }
 0x3f5   : > { %v3192_v22 = vmax.f32 %v3190_v7, %v3191_v46  ;;  %v3203_v61 = vrot.slane %v3202_v50, 1  ;;  %v2196_v63 = vpop.f32.mrf.mxu0  ;;  %v2486_v7 = vpop.f32.mrf.mxu1 }
 0x3f6   : > { %v2205_v17 = vadd.f32 %v2196_v63, %v2147_v9  ;;  %v2150_v6 = vadd.f32 %v4413_v37, %v2091_v21 }
 0x3f7   : > { %vm3205_vm10 = vcmp.eq.f32.partialorder %v1963_v25, %v3192_v22  ;;  %vm3207_vm8 = vcmp.eq.f32.partialorder %v4417_v32, %v3192_v22  ;;  %vm3209_vm9 = vcmp.eq.f32.partialorder %v1973_v62, %v3192_v22  ;;  %v3204_v12 = vmax.f32 %v3202_v50, %v3203_v61  ;;  %v2198_v13 = vpop.f32.mrf.mxu0  ;;  %v2488_v50 = vpop.f32.mrf.mxu1 }
 0x3f8   : > { %v3211_v39 = vsel %vm3205_vm10, %v4826_v40, 19  ;;  %v3215_v23 = vsel %vm3209_vm9, %v4436_v19, 19  ;;  %v3213_v58 = vsel %vm3207_vm8, %v4439_v5, 19  ;;  %v2263_v10 = vadd.f32 %v4419_v16, %v2205_v17 }
 0x3f9   : > { %v3217_v2 = vsel %vm3183_vm2, %v3215_v23, 2147483647  ;;  %vm3206_vm6 = vcmp.eq.f32.partialorder %v4415_v56, %v3204_v12  ;;  %vm3208_vm7 = vcmp.eq.f32.partialorder %v1969_v49, %v3204_v12  ;;  %vm3210_vm5 = vcmp.eq.f32.partialorder %v1975_v36, %v3204_v12  ;;  %v2200_v51 = vpop.f32.mrf.mxu0 }
 0x3fa   : > { %vm3218_vm4 = vcmp.lt.s32.totalorder %v3211_v39, %v3217_v2  ;;  %v3212_v45 = vsel %vm3206_vm6, %v4826_v40, 19  ;;  %v3214_v25 = vsel %vm3208_vm7, %v4439_v5, 19  ;;  %v3216_v62 = vsel %vm3210_vm5, %v4436_v19, 19 }
 0x3fb   : > { %v3219_v24 = vsel %vm3218_vm4, %v3211_v39, %v3217_v2  ;;  %v3231_v3 = vsel %vm1922_vm12, %v3212_v45, 2147483647  ;;  %v3233_v56 = vsel %vm3195_vm0, %v3216_v62, 2147483647  ;;  %v2202_v49 = vpop.f32.mrf.mxu0  ;;  %v2206_v36 = vadd.f32 %v2198_v13, %v2148_v11  ;;  %v2490_v11 = vpop.f32.mrf.mxu1  ;;  %v4831_v13 = vld [vmem:[#allocation4_spill] sm:$0xff] }
 0x3fc   : > { %vm3220_vm9 = vcmp.lt.s32.totalorder %v3219_v24, %v3213_v58  ;;  %vm3234_vm10 = vcmp.lt.s32.totalorder %v3231_v3, %v3233_v56  ;;  %v3232_v0 = vsel %vm1922_vm12, %v3214_v25, 2147483647  ;;  %v2207_v32 = vadd.f32 %v2200_v51, %v2149_v15 }
 0x3fd   : > { %v4455_v30 = vsel %vm3220_vm9, %v3219_v24, %v3213_v58  ;;  %v3235_v41 = vsel %vm3234_vm10, %v3231_v3, %v3233_v56  ;;  %v2312_v57 = vpop.f32.mrf.mxu0  ;;  %v2208_v38 = vadd.f32 %v2202_v49, %v2150_v6  ;;  %v2264_v14 = vadd.f32 %v4421_v28, %v2206_v36  ;;  %v2492_v45 = vpop.f32.mrf.mxu1  ;;  %v4833_v24 = vld [vmem:[#allocation6_spill] sm:$0xff]  ;;  %v4834_v49 = vld [vmem:[#allocation7_spill] sm:$0xff] }
 0x3fe   : > { %4829 = vst [vmem:[#allocation12_spill] sm:$0xff] %v4455_v30  ;;  %vm3236_vm5 = vcmp.lt.s32.totalorder %v3235_v41, %v3232_v0  ;;  %v2321_v54 = vadd.f32 %v2312_v57, %v2263_v10  ;;  %v2265_v35 = vadd.f32 %v4428_v4, %v2207_v32  ;;  %vm4839_vm4 = vcmask 1031168  }
 0x3ff   : > { %v4460_v42 = vsel %vm3236_vm5, %v3235_v41, %v3232_v0  ;;  %v2314_v47 = vpop.f32.mrf.mxu0  ;;  %v2266_v46 = vadd.f32 %v4431_v53, %v2208_v38  ;;  %vm4841_vm6 = vcmask 883712   ;;  %vm4845_vm7 = vcmask 875520   ;;  %v4859_v41 = vld [vmem:[#allocation27_spill] sm:$0xff] }
 0x400   : > { %4830 = vst [vmem:[#allocation34_spill] sm:$0xff] %v4460_v42  ;;  %v2322_v34 = vadd.f32 %v2314_v47, %v2264_v14  ;;  %v2379_v37 = vadd.f32 %v4433_v33, %v2321_v54  ;;  %vm4848_vm8 = vcmask 711680  }
 0x401   : > { %v2316_v44 = vpop.f32.mrf.mxu0 }
 0x402   : > { %v2323_v43 = vadd.f32 %v2316_v44, %v2265_v35  ;;  %v2380_v61 = vadd.f32 %v2372_v29, %v2322_v34  ;;  %v4832_v29 = vld [vmem:[#allocation5_spill] sm:$0xff]  ;;  %v3700_v35 = vld [vmem:[%s4670_s4] sm:$0xff]  }
 0x403   : > { %v2318_v1 = vpop.f32.mrf.mxu0 }
 0x404   : > { %v2324_v55 = vadd.f32 %v2318_v1, %v2266_v46  ;;  %v2381_v28 = vadd.f32 %v2374_v18, %v2323_v43  ;;  %v3701_v1 = vld [vmem:[%s4670_s4 + $0x8] sm:$0xff]  }
 0x405   : > { %v2428_v16 = vpop.f32.mrf.mxu0 }
 0x406   : > { %v2437_v22 = vadd.f32 %v2428_v16, %v2379_v37  ;;  %v2382_v21 = vadd.f32 %v2376_v27, %v2324_v55 }
 0x407   : > { %v2430_v63 = vpop.f32.mrf.mxu0 }
 0x408   : > { %v2495_v8 = vadd.f32 %v2486_v7, %v2437_v22  ;;  %v2438_v9 = vadd.f32 %v2430_v63, %v2380_v61  ;;  %v4840_v22 = vld [vmem:[#allocation14_spill] sm:$0xff] }
 0x409   : > { %v2432_v12 = vpop.f32.mrf.mxu0 }
 0x40a   : > { %v2499_v39 = vadd.f32 %v2495_v8, %v4831_v13  ;;  %v2496_v4 = vadd.f32 %v2488_v50, %v2438_v9  ;;  %v2439_v23 = vadd.f32 %v2432_v12, %v2381_v28  ;;  %v4843_v12 = vld [vmem:[#allocation16_spill] sm:$0xff] }
 0x40b   : > { %v2434_v17 = vpop.f32.mrf.mxu0 }
 0x40c   : > { %v2503_v53 = vmax.f32 %v2499_v39, 0.0  ;;  %v2500_v33 = vadd.f32 %v2496_v4, %v4831_v13  ;;  %v2497_v2 = vadd.f32 %v2490_v11, %v2439_v23  ;;  %v2440_v51 = vadd.f32 %v2434_v17, %v2382_v21  ;;  %v4842_v11 = vld [vmem:[#allocation15_spill] sm:$0xff]  ;;  %v4846_v17 = vld [vmem:[#allocation17_spill] sm:$0xff] }
 0x40e   : > { %v2504_v25 = vmax.f32 %v2500_v33, 0.0  ;;  %v2501_v62 = vadd.f32 %v2497_v2, %v4832_v29  ;;  %v2498_v58 = vadd.f32 %v2492_v45, %v2440_v51  ;;  %v2507_v18 = vmul.f32 %v2503_v53, %v4833_v24  ;;  %v4847_v53 = vld [vmem:[#allocation18_spill] sm:$0xff] }
 0x410   : > { %v2505_v3 = vmax.f32 %v2501_v62, 0.0  ;;  %v2502_v56 = vadd.f32 %v2498_v58, %v4832_v29  ;;  %v2508_v36 = vmul.f32 %v2504_v25, %v4834_v49  ;;  %v2511_v57 = vsel %vm3990_vm15, 0.0, %v2507_v18  ;;  %v4849_v25 = vld [vmem:[#allocation19_spill] sm:$0xff]  ;;  %v4850_v29 = vld [vmem:[#allocation20_spill] sm:$0xff]  ;;  %v4852_v58 = vld [vmem:[#allocation21_spill] sm:$0xff] }
 0x412   : > { %v2509_v15 = vmul.f32 %v2505_v3, %v4833_v24  ;;  %v2506_v0 = vmax.f32 %v2502_v56, 0.0  ;;  %v2512_v47 = vsel %vm3996_vm1, 0.0, %v2508_v36  ;;  %v4853_v24 = vld [vmem:[#allocation22_spill] sm:$0xff]  ;;  %v4854_v3 = vld [vmem:[#allocation23_spill] sm:$0xff]  ;;  %v4855_v56 = vld [vmem:[#allocation24_spill] sm:$0xff] }
 0x414   : > { %v2513_v27 = vsel %vm3990_vm15, 0.0, %v2509_v15  ;;  %v2510_v32 = vmul.f32 %v2506_v0, %v4834_v49  ;;  %v3586_v14 = vpack.c.bf16 %v2509_v15, %v2507_v18  ;;  %vm4851_vm15 = vcmask 719872   ;;  %v4857_v15 = vld [vmem:[#allocation25_spill] sm:$0xff]  ;;  %v4858_v0 = vld [vmem:[#allocation26_spill] sm:$0xff] }
 0x415   : > { %v2515_v6 = vpack.c.bf16 %v2513_v27, %v2511_v57  ;;  %v4860_v57 = vld [vmem:[#allocation28_spill] sm:$0xff]  ;;  %v4861_v27 = vld [vmem:[#allocation29_spill] sm:$0xff] }
 0x416   : > { %v2514_v38 = vsel %vm3996_vm1, 0.0, %v2510_v32  ;;  %v3581_v54 = vpack.c.bf16 %v2510_v32, %v2508_v36  ;;  %vm4856_vm1 = vcmask 703488  }
 0x417   : > { %v2516_v44 = vpack.c.bf16 %v2514_v38, %v2512_v47  ;;  %2519 = vrot.lane.b32.xlu1 %v2515_v6, %s3744_s27 }
 0x418   : > { %3582 = vmatprep.subr.msk.bf16.mxu1 %vm4011_vm13, %v3581_v54 }
 0x419   : > { %3587 = vmatpush1.bf16.msk.msra.mxu1 %vm4019_vm14, %v3586_v14  ;;  %2521 = vrot.lane.b32.xlu0 %v2516_v44, %s3744_s27 }
 0x41b   : > { %2632 = vrot.lane.b32.xlu1 %v2515_v6, %s3745_s28 }
 0x41c   : > { %3588 = vmatmul.mubr.msk.bf16.vlgmr.msra.gmra.mxu1 %vm1115_vm11, %v3700_v35 }
 0x41d   : > { %2634 = vrot.lane.b32.xlu0 %v2516_v44, %s3745_s28  ;;  %2621 = vmatprep.mubr.bf16.mxu1 %v4819_v59 }
 0x41f   : > { %2700 = vrot.lane.b32.xlu1 %v2515_v6, %s4774_s17 }
 0x421   : > { %2702 = vrot.lane.b32.xlu0 %v2516_v44, %s4774_s17 }
 0x423   : > { %2768 = vrot.lane.b32.xlu1 %v2515_v6, %s4775_s18 }
 0x424   : > { %3589 = vmatmul.mubr.msk.bf16.gmra.mxu1 %vm1115_vm11, %v3701_v1 }
 0x425   : > { %2770 = vrot.lane.b32.xlu0 %v2516_v44, %s4775_s18  ;;  %2739 = vmatprep.mubr.bf16.mxu1 %v4819_v59 }
 0x427   : > { %2836 = vrot.lane.b32.xlu1 %v2515_v6, %s4776_s22 }
 0x429   : > { %2838 = vrot.lane.b32.xlu0 %v2516_v44, %s4776_s22 }
 0x42b   : > { %2904 = vrot.lane.b32.xlu1 %v2515_v6, %s4777_s23 }
 0x42d   : > { %2906 = vrot.lane.b32.xlu0 %v2516_v44, %s4777_s23 }
 0x42f   : > { %2972 = vrot.lane.b32.xlu1 %v2515_v6, %s4778_s16 }
 0x431   : > { %2974 = vrot.lane.b32.xlu0 %v2516_v44, %s4778_s16 }
 0x433   : > { %3040 = vrot.lane.b32.xlu1 %v2515_v6, %s3751_s24 }
 0x435   : > { %3042 = vrot.lane.b32.xlu0 %v2516_v44, %s3751_s24 }
 0x489   : > { %v2520_v43 = vpop.permute.xlu1 %2519 }
 0x48b   : > { %v2522_v46 = vpop.permute.xlu0 %2521 }
 0x48c   : > { %v2523_v37 = vsel %vm435_vm3, %v2520_v43, %v2522_v46  ;;  %2540 = vmatprep.subr.bf16.mxu0 %v2522_v46  ;;  %vm4844_vm3 = vcmask 867328  }
 0x48d   : > { %v2633_v50 = vpop.permute.xlu1 %2632  ;;  %2541 = vmatpush1.bf16.msra.mxu0 %v2523_v37 }
 0x48f   : > { %v2635_v16 = vpop.permute.xlu0 %2634 }
 0x490   : > { %v2636_v55 = vsel %vm4839_vm4, %v2633_v50, %v2635_v16  ;;  %3576 = vmatmul.mubr.msk.bf16.vlgmr.msra.gmra.mxu0 %vm1115_vm11, %v4840_v22  ;;  %2653 = vmatprep.subr.bf16.mxu0 %v2635_v16 }
 0x491   : > { %v2701_v61 = vpop.permute.xlu1 %2700  ;;  %2654 = vmatpush1.bf16.msra.mxu0 %v2636_v55  ;;  %2568 = vmatprep.mubr.bf16.mxu0 %v4819_v59 }
 0x493   : > { %v2703_v63 = vpop.permute.xlu0 %2702 }
 0x494   : > { %v2704_v8 = vsel %vm4841_vm6, %v2701_v61, %v2703_v63  ;;  %2721 = vmatprep.subr.bf16.mxu1 %v2703_v63 }
 0x495   : > { %v2769_v9 = vpop.permute.xlu1 %2768  ;;  %2722 = vmatpush1.bf16.msra.mxu1 %v2704_v8 }
 0x497   : > { %v2771_v28 = vpop.permute.xlu0 %2770 }
 0x498   : > { %3577 = vmatmul.mubr.msk.bf16.gmra.mxu0 %vm1115_vm11, %v4842_v11  ;;  %3592 = vmatmul.mubr.msk.bf16.vlgmr.msra.gmra.mxu1 %vm1115_vm11, %v4843_v12  ;;  %v2772_v21 = vsel %vm4845_vm7, %v2769_v9, %v2771_v28 }
 0x499   : > { %2789 = vmatprep.subr.bf16.mxu0 %v2771_v28  ;;  %2671 = vmatprep.mubr.bf16.mxu0 %v4819_v59  ;;  %v2837_v13 = vpop.permute.xlu1 %2836 }
 0x49a   : > { %2749 = vmatprep.mubr.bf16.mxu1 %v4819_v59 }
 0x49b   : > { %v2839_v39 = vpop.permute.xlu0 %2838 }
 0x49c   : > { %v2840_v4 = vsel %vm4844_vm3, %v2837_v13, %v2839_v39  ;;  %2857 = vmatprep.subr.bf16.mxu1 %v2839_v39 }
 0x49d   : > { %2858 = vmatpush1.bf16.msra.mxu1 %v2840_v4  ;;  %v2905_v33 = vpop.permute.xlu1 %2904 }
 0x49f   : > { %v2907_v23 = vpop.permute.xlu0 %2906 }
 0x4a0   : > { %3590 = vmatmul.mubr.msk.bf16.vlgmr.msra.gmra.mxu0 %vm1115_vm11, %v4846_v17  ;;  %3593 = vmatmul.mubr.msk.bf16.gmra.mxu1 %vm1115_vm11, %v4847_v53  ;;  %v2908_v62 = vsel %vm4851_vm15, %v2905_v33, %v2907_v23 }
 0x4a1   : > { %2790 = vmatpush1.bf16.msra.mxu0 %v2772_v21  ;;  %2681 = vmatprep.mubr.bf16.mxu0 %v4819_v59  ;;  %v2973_v51 = vpop.permute.xlu1 %2972 }
 0x4a2   : > { %2925 = vmatprep.subr.bf16.mxu0 %v2907_v23  ;;  %2875 = vmatprep.mubr.bf16.mxu1 %v4819_v59 }
 0x4a3   : > { %v2975_v2 = vpop.permute.xlu0 %2974 }
 0x4a4   : > { %2993 = vmatprep.subr.bf16.mxu1 %v2975_v2  ;;  %v2976_v45 = vsel %vm4848_vm8, %v2973_v51, %v2975_v2 }
 0x4a5   : > { %v3041_v49 = vpop.permute.xlu1 %3040 }
 0x4a7   : > { %v3043_v18 = vpop.permute.xlu0 %3042 }
 0x4a8   : > { %3591 = vmatmul.mubr.msk.bf16.gmra.mxu0 %vm1115_vm11, %v4849_v25  ;;  %3596 = vmatmul.mubr.msk.bf16.vlgmr.msra.gmra.mxu1 %vm1115_vm11, %v4850_v29  ;;  %v3044_v36 = vsel %vm4856_vm1, %v3041_v49, %v3043_v18 }
 0x4a9   : > { %2994 = vmatpush1.bf16.msra.mxu1 %v2976_v45  ;;  %2807 = vmatprep.mubr.bf16.mxu0 %v4819_v59 }
 0x4aa   : > { %2885 = vmatprep.mubr.bf16.mxu1 %v4819_v59 }
 0x4b0   : > { %3594 = vmatmul.mubr.msk.bf16.vlgmr.msra.gmra.mxu0 %vm1115_vm11, %v4852_v58  ;;  %3597 = vmatmul.mubr.msk.bf16.gmra.mxu1 %vm1115_vm11, %v4853_v24 }
 0x4b1   : > { %2926 = vmatpush1.bf16.msra.mxu0 %v2908_v62  ;;  %2817 = vmatprep.mubr.bf16.mxu0 %v4819_v59 }
 0x4b2   : > { %3061 = vmatprep.subr.bf16.mxu0 %v3043_v18  ;;  %3011 = vmatprep.mubr.bf16.mxu1 %v4819_v59 }
 0x4b8   : > { %3595 = vmatmul.mubr.msk.bf16.gmra.mxu0 %vm1115_vm11, %v4854_v3  ;;  %3600 = vmatmul.mubr.msk.bf16.vlgmr.msra.gmra.mxu1 %vm1115_vm11, %v4855_v56 }
 0x4b9   : > { %2943 = vmatprep.mubr.bf16.mxu0 %v4819_v59  ;;  %3021 = vmatprep.mubr.bf16.mxu1 %v4819_v59 }
 0x4c0   : > { %3598 = vmatmul.mubr.msk.bf16.vlgmr.msra.gmra.mxu0 %vm1115_vm11, %v4857_v15  ;;  %3601 = vmatmul.mubr.msk.bf16.gmra.mxu1 %vm1115_vm11, %v4858_v0 }
 0x4c1   : > { %3062 = vmatpush1.bf16.msra.mxu0 %v3044_v36  ;;  %2953 = vmatprep.mubr.bf16.mxu0 %v4819_v59 }
 0x4c2   : > { %3160 = vmatprep.mubr.bf16.mxu1 %v4819_v59 }
 0x4c8   : > { %3599 = vmatmul.mubr.msk.bf16.gmra.mxu0 %vm1115_vm11, %v4859_v41 }
 0x4c9   : > { %3079 = vmatprep.mubr.bf16.mxu0 %v4819_v59 }
 0x4d0   : > { %3602 = vmatmul.mubr.msk.bf16.vlgmr.msra.gmra.mxu0 %vm1115_vm11, %v4860_v57 }
 0x4d1   : > { %3089 = vmatprep.mubr.bf16.mxu0 %v4819_v59 }
 0x4d8   : > { %3603 = vmatmul.mubr.msk.bf16.gmra.mxu0 %vm1115_vm11, %v4861_v27 }
 0x4dc   : > { %v2613_v32 = vpop.f32.mrf.mxu1 }
 0x4de   : > { %v4567_v6 = vpop.f32.mrf.mxu1 }
 0x4e0   : > { %v2617_v10 = vpop.f32.mrf.mxu1 }
 0x4e2   : > { %v2619_v47 = vpop.f32.mrf.mxu1 }
 0x4e4   : > { %v2623_v38 = vpop.f32.mrf.mxu1 }
 0x4e6   : > { %v2625_v54 = vpop.f32.mrf.mxu1 }
 0x4e8   : > { %v2627_v7 = vpop.f32.mrf.mxu1 }
 0x4ea   : > { %v4569_v1 = vpop.f32.mrf.mxu1 }
 0x550   : > { %v2560_v14 = vpop.f32.mrf.mxu0 }
 0x551   : > { %v2614_v15 = vadd.f32 %v2613_v32, %v2560_v14 }
 0x552   : > { %v2562_v44 = vpop.f32.mrf.mxu0 }
 0x554   : > { %v2564_v34 = vpop.f32.mrf.mxu0 }
 0x555   : > { %v2618_v5 = vadd.f32 %v2617_v10, %v2564_v34 }
 0x556   : > { %v2566_v35 = vpop.f32.mrf.mxu0 }
 0x557   : > { %v2620_v26 = vadd.f32 %v2619_v47, %v2566_v35 }
 0x558   : > { %v2570_v43 = vpop.f32.mrf.mxu0  ;;  %v2741_v46 = vpop.f32.mrf.mxu1 }
 0x559   : > { %v2624_v32 = vadd.f32 %v2623_v38, %v2570_v43 }
 0x55a   : > { %v2572_v37 = vpop.f32.mrf.mxu0  ;;  %v4571_v50 = vpop.f32.mrf.mxu1 }
 0x55b   : > { %v2626_v52 = vadd.f32 %v2625_v54, %v2572_v37 }
 0x55c   : > { %v2574_v16 = vpop.f32.mrf.mxu0  ;;  %v2745_v55 = vpop.f32.mrf.mxu1 }
 0x55e   : > { %v2576_v22 = vpop.f32.mrf.mxu0  ;;  %v2747_v61 = vpop.f32.mrf.mxu1 }
 0x560   : > { %v2673_v63 = vpop.f32.mrf.mxu0  ;;  %v4573_v8 = vpop.f32.mrf.mxu1 }
 0x561   : > { %v2692_v57 = vadd.f32 %v2673_v63, %v2614_v15  ;;  %v2628_v63 = vadd.f32 %v2627_v7, %v2574_v16 }
 0x562   : > { %v2675_v9 = vpop.f32.mrf.mxu0  ;;  %v2753_v28 = vpop.f32.mrf.mxu1 }
 0x563   : > { %v2760_v42 = vadd.f32 %v2741_v46, %v2692_v57 }
 0x564   : > { %v2677_v11 = vpop.f32.mrf.mxu0  ;;  %v4575_v12 = vpop.f32.mrf.mxu1 }
 0x565   : > { %v2694_v30 = vadd.f32 %v2677_v11, %v2618_v5 }
 0x566   : > { %v2679_v13 = vpop.f32.mrf.mxu0  ;;  %v4577_v39 = vpop.f32.mrf.mxu1 }
 0x567   : > { %v2762_v48 = vadd.f32 %v2745_v55, %v2694_v30  ;;  %v2695_v14 = vadd.f32 %v2679_v13, %v2620_v26 }
 0x568   : > { %v2683_v4 = vpop.f32.mrf.mxu0  ;;  %v2877_v23 = vpop.f32.mrf.mxu1 }
 0x569   : > { %v2763_v11 = vadd.f32 %v2747_v61, %v2695_v14 }
 0x56a   : > { %v2685_v21 = vpop.f32.mrf.mxu0  ;;  %v4579_v17 = vpop.f32.mrf.mxu1 }
 0x56b   : > { %v2697_v15 = vadd.f32 %v2685_v21, %v2626_v52 }
 0x56c   : > { %v2687_v53 = vpop.f32.mrf.mxu0  ;;  %v2881_v33 = vpop.f32.mrf.mxu1 }
 0x56d   : > { %v2698_v47 = vadd.f32 %v2687_v53, %v2628_v63  ;;  %v2765_v30 = vadd.f32 %v2753_v28, %v2697_v15 }
 0x56e   : > { %v2689_v2 = vpop.f32.mrf.mxu0  ;;  %v4581_v51 = vpop.f32.mrf.mxu1 }
 0x570   : > { %v2809_v45 = vpop.f32.mrf.mxu0  ;;  %v4583_v25 = vpop.f32.mrf.mxu1 }
 0x571   : > { %4862 = vst [vmem:[#allocation35_spill] sm:$0xff] %v4583_v25  ;;  %v2828_v59 = vadd.f32 %v2809_v45, %v2760_v42  ;;  %v2630_v42 = vadd.f32 %v4569_v1, %v2576_v22 }
 0x572   : > { %v2811_v29 = vpop.f32.mrf.mxu0  ;;  %v4585_v62 = vpop.f32.mrf.mxu1 }
 0x573   : > { %v2896_v10 = vadd.f32 %v2877_v23, %v2828_v59  ;;  %v2699_v37 = vadd.f32 %v2689_v2, %v2630_v42 }
 0x574   : > { %v2813_v58 = vpop.f32.mrf.mxu0  ;;  %v4587_v18 = vpop.f32.mrf.mxu1 }
 0x575   : > { %4863 = vst [vmem:[#allocation36_spill] sm:$0xff] %v4587_v18  ;;  %v2830_v34 = vadd.f32 %v2813_v58, %v2762_v48  ;;  %v2767_v61 = vadd.f32 %v4577_v39, %v2699_v37  ;;  %v4868_v39 = vld [vmem:[#allocation33_spill] sm:$0xff] }
 0x576   : > { %v2815_v24 = vpop.f32.mrf.mxu0  ;;  %v4589_v49 = vpop.f32.mrf.mxu1 }
 0x577   : > { %4864 = vst [vmem:[#allocation37_spill] sm:$0xff] %v4589_v49  ;;  %v2616_v49 = vadd.f32 %v4567_v6, %v2562_v44  ;;  %v2898_v6 = vadd.f32 %v2881_v33, %v2830_v34  ;;  %v2831_v52 = vadd.f32 %v2815_v24, %v2763_v11  ;;  %v2766_v44 = vadd.f32 %v4575_v12, %v2698_v47 }
 0x578   : > { %v2819_v3 = vpop.f32.mrf.mxu0  ;;  %v3013_v41 = vpop.f32.mrf.mxu1  ;;  %v4866_v21 = vld [vmem:[#allocation35_spill] sm:$0xff] }
 0x579   : > { %v2693_v25 = vadd.f32 %v2675_v9, %v2616_v49  ;;  %v2899_v13 = vadd.f32 %v4581_v51, %v2831_v52 }
 0x57a   : > { %v2821_v56 = vpop.f32.mrf.mxu0  ;;  %v4591_v40 = vpop.f32.mrf.mxu1 }
 0x57b   : > { %4865 = vst [vmem:[#allocation38_spill] sm:$0xff] %v4591_v40  ;;  %v2696_v40 = vadd.f32 %v2683_v4, %v2624_v32  ;;  %v2761_v26 = vadd.f32 %v4571_v50, %v2693_v25  ;;  %v2833_v7 = vadd.f32 %v2821_v56, %v2765_v30 }
 0x57c   : > { %v2823_v36 = vpop.f32.mrf.mxu0  ;;  %v3017_v60 = vpop.f32.mrf.mxu1  ;;  %v4867_v2 = vld [vmem:[#allocation36_spill] sm:$0xff] }
 0x57d   : > { %v2764_v38 = vadd.f32 %v4573_v8, %v2696_v40  ;;  %v2829_v1 = vadd.f32 %v2811_v29, %v2761_v26  ;;  %v2834_v9 = vadd.f32 %v2823_v36, %v2766_v44  ;;  %v2901_v40 = vadd.f32 %v4585_v62, %v2833_v7 }
 0x57e   : > { %v2825_v0 = vpop.f32.mrf.mxu0  ;;  %v3019_v46 = vpop.f32.mrf.mxu1  ;;  %v4869_v49 = vld [vmem:[#allocation37_spill] sm:$0xff] }
 0x57f   : > { %v2832_v55 = vadd.f32 %v2819_v3, %v2764_v38  ;;  %v2835_v8 = vadd.f32 %v2825_v0, %v2767_v61  ;;  %v2897_v12 = vadd.f32 %v4579_v17, %v2829_v1  ;;  %v2902_v45 = vadd.f32 %v4867_v2, %v2834_v9  ;;  %v4873_v38 = vld [vmem:[#allocation30_spill] sm:$0xff] }
 0x580   : > { %v2945_v27 = vpop.f32.mrf.mxu0  ;;  %v3023_v59 = vpop.f32.mrf.mxu1 }
 0x581   : > { %v2964_v35 = vadd.f32 %v2945_v27, %v2896_v10  ;;  %v2900_v53 = vadd.f32 %v4866_v21, %v2832_v55  ;;  %v2903_v62 = vadd.f32 %v4869_v49, %v2835_v8  ;;  %v4877_v49 = vld [vmem:[#allocation12_spill] sm:$0xff] }
 0x582   : > { %v2947_v19 = vpop.f32.mrf.mxu0  ;;  %v3025_v50 = vpop.f32.mrf.mxu1  ;;  %v4871_v14 = vld [vmem:[#allocation38_spill] sm:$0xff] }
 0x583   : > { %v3032_v43 = vadd.f32 %v3013_v41, %v2964_v35  ;;  %v2965_v24 = vadd.f32 %v2947_v19, %v2897_v12 }
 0x584   : > { %v2949_v31 = vpop.f32.mrf.mxu0  ;;  %v3027_v3 = vpop.f32.mrf.mxu1 }
 0x585   : > { %v2966_v16 = vadd.f32 %v2949_v31, %v2898_v6  ;;  %v3033_v63 = vadd.f32 %v4871_v14, %v2965_v24  ;;  %v4872_v6 = vld [vmem:[#allocation31_spill] sm:$0xff] }
 0x586   : > { %v2951_v20 = vpop.f32.mrf.mxu0  ;;  %v3029_v10 = vpop.f32.mrf.mxu1 }
 0x587   : > { %v3034_v23 = vadd.f32 %v3017_v60, %v2966_v16  ;;  %v2967_v31 = vadd.f32 %v2951_v20, %v2899_v13  ;;  %v4870_v60 = vld [vmem:[#allocation32_spill] sm:$0xff] }
 0x588   : > { %v2955_v18 = vpop.f32.mrf.mxu0 }
 0x589   : > { %v2968_v51 = vadd.f32 %v2955_v18, %v2900_v53  ;;  %v3035_v17 = vadd.f32 %v3019_v46, %v2967_v31 }
 0x58a   : > { %v2957_v5 = vpop.f32.mrf.mxu0 }
 0x58b   : > { %v2969_v25 = vadd.f32 %v2957_v5, %v2901_v40  ;;  %v3036_v15 = vadd.f32 %v3023_v59, %v2968_v51  ;;  %v4876_v40 = vld [vmem:[#allocation41_spill] sm:$0xff] }
 0x58c   : > { %v2959_v54 = vpop.f32.mrf.mxu0 }
 0x58d   : > { %v2970_v36 = vadd.f32 %v2959_v54, %v2902_v45  ;;  %v3037_v57 = vadd.f32 %v3025_v50, %v2969_v25  ;;  %v4874_v50 = vld [vmem:[#allocation40_spill] sm:$0xff] }
 0x58e   : > { %v2961_v48 = vpop.f32.mrf.mxu0 }
 0x58f   : > { %v2971_v20 = vadd.f32 %v2961_v48, %v2903_v62  ;;  %v3038_v19 = vadd.f32 %v3027_v3, %v2970_v36  ;;  %v3222_v62 = vrot.slane %v4877_v49, 4 }
 0x590   : > { %v3081_v22 = vpop.f32.mrf.mxu0 }
 0x591   : > { %v3100_v28 = vadd.f32 %v3081_v22, %v3032_v43  ;;  %v3039_v11 = vadd.f32 %v3029_v10, %v2971_v20  ;;  %vm3223_vm13 = vcmp.lt.s32.totalorder %v4877_v49, %v3222_v62 }
 0x592   : > { %v3083_v4 = vpop.f32.mrf.mxu0 }
 0x593   : > { %v3108_v29 = vadd.f32 %v3100_v28, %v4868_v39  ;;  %v3101_v54 = vadd.f32 %v3083_v4, %v3033_v63  ;;  %v4875_v4 = vmov 0   ;;  %v3224_v63 = vsel %vm3223_vm13, %v4877_v49, %v3222_v62 }
 0x594   : > { %v3085_v33 = vpop.f32.mrf.mxu0 }
 0x595   : > { %v3102_v58 = vadd.f32 %v3085_v33, %v3034_v23  ;;  %v3116_v27 = vmax.f32 %v3108_v29, 0.0  ;;  %v3109_v44 = vadd.f32 %v3101_v54, %v4868_v39 }
 0x596   : > { %v3087_v56 = vpop.f32.mrf.mxu0 }
 0x597   : > { %v3110_v0 = vadd.f32 %v3102_v58, %v4870_v60  ;;  %v3103_v5 = vadd.f32 %v3087_v56, %v3035_v17  ;;  %v3117_v61 = vmax.f32 %v3109_v44, 0.0 }
 0x598   : > { %v3091_v41 = vpop.f32.mrf.mxu0 }
 0x599   : > { %v3118_v32 = vmax.f32 %v3110_v0, 0.0  ;;  %v3104_v47 = vadd.f32 %v3091_v41, %v3036_v15  ;;  %v3111_v37 = vadd.f32 %v3103_v5, %v4870_v60  ;;  %v4878_v0 = vld [vmem:[#allocation34_spill] sm:$0xff] }
 0x59a   : > { %v3093_v34 = vpop.f32.mrf.mxu0  ;;  %v3238_v17 = vrot.slane %v4878_v0, 4 }
 0x59b   : > { %v3124_v18 = vpack.c.bf16 %v3118_v32, %v3116_v27  ;;  %v3105_v42 = vadd.f32 %v3093_v34, %v3037_v57  ;;  %v3112_v59 = vadd.f32 %v3104_v47, %v4872_v6  ;;  %v3119_v16 = vmax.f32 %v3111_v37, 0.0 }
 0x59c   : > { %v3095_v35 = vpop.f32.mrf.mxu0  ;;  %vm3239_vm14 = vcmp.lt.s32.totalorder %v4878_v0, %v3238_v17 }
 0x59d   : > { %v3106_v30 = vadd.f32 %v3095_v35, %v3038_v19  ;;  %v3113_v26 = vadd.f32 %v3105_v42, %v4872_v6  ;;  %v3120_v22 = vmax.f32 %v3112_v59, 0.0  ;;  %v3125_v13 = vpack.c.bf16 %v3119_v16, %v3117_v61  ;;  %v4879_v42 = vld [vmem:[#allocation3_spill] sm:$0xff]  ;;  %v4880_v35 = vld [vmem:[#allocation2_spill] sm:$0xff] }
 0x59e   : > { %v3097_v46 = vpop.f32.mrf.mxu0  ;;  %v3240_v15 = vsel %vm3239_vm14, %v4878_v0, %v3238_v17  ;;  %v3225_v19 = vrot.slane %v3224_v63, 2 }
 0x59f   : > { %v3114_v52 = vadd.f32 %v3106_v30, %v4873_v38  ;;  %v3107_v48 = vadd.f32 %v3097_v46, %v3039_v11  ;;  %v3121_v1 = vmax.f32 %v3113_v26, 0.0  ;;  %v3241_v5 = vrot.slane %v3240_v15, 2  ;;  %v4881_v46 = vld [vmem:[#allocation13_spill] sm:$0xff] }
 0x5a1   : > { %v3115_v7 = vadd.f32 %v3107_v48, %v4873_v38  ;;  %v3122_v43 = vmax.f32 %v3114_v52, 0.0  ;;  %vm3242_vm15 = vcmp.lt.s32.totalorder %v3240_v15, %v3241_v5 }
 0x5a3   : > { %v3123_v55 = vmax.f32 %v3115_v7, 0.0  ;;  %v3126_v28 = vpack.c.bf16 %v3122_v43, %v3120_v22  ;;  %v3243_v22 = vsel %vm3242_vm15, %v3240_v15, %v3241_v5 }
 0x5a5   : > { %v3127_v9 = vpack.c.bf16 %v3123_v55, %v3121_v1 }
 0x5a7   : > { %3140 = vmatprep.subr.bf16.mxu1 %v3127_v9 }
 0x5a8   : > { %3141 = vmatpush1.bf16.msra.mxu1 %v3126_v28 }
 0x5a9   : > { %3142 = vmatprep.subr.bf16.mxu1 %v3125_v13 }
 0x5ac   : > { %3143 = vmatpush1.bf16.msra.mxu1 %v3124_v18 }
 0x5af   : > { %3604 = vmatmul.mubr.msk.bf16.vlgmr.msra.gmra.mxu1 %vm1922_vm12, %v4874_v50  ;;  %v3244_v50 = vrot.slane %v3243_v22, 1 }
 0x5b0   : > { %3170 = vmatprep.mubr.bf16.mxu1 %v4875_v4 }
 0x5b7   : > { %3605 = vmatmul.mubr.msk.bf16.gmra.mxu1 %vm1922_vm12, %v4876_v40 }
 0x66f   : > { %v3162_v8 = vpop.f32.mrf.mxu1 }
 0x671   : > { %v3164_v23 = vpop.f32.mrf.mxu1 }
 0x672   : > { %v3256_v45 = vsel %vm1922_vm12, %v3164_v23, -inf }
 0x673   : > { %v3166_v12 = vpop.f32.mrf.mxu1 }
 0x675   : > { %v3168_v21 = vpop.f32.mrf.mxu1 }
 0x676   : > { %v3257_v24 = vsel %vm1922_vm12, %v3168_v21, -inf }
 0x677   : > { %v3172_v53 = vpop.f32.mrf.mxu1 }
 0x678   : > { %v3247_v31 = vsel %vm3183_vm2, %v3172_v53, -inf }
 0x679   : > { %v3248_v33 = vmax.f32 %v3162_v8, %v3247_v31  ;;  %v3174_v2 = vpop.f32.mrf.mxu1 }
 0x67a   : > { %v3258_v25 = vsel %vm3195_vm0, %v3174_v2, -inf }
 0x67b   : > { %v3249_v39 = vmax.f32 %v3248_v33, %v3166_v12  ;;  %v3259_v29 = vmax.f32 %v3256_v45, %v3258_v25  ;;  %v3176_v58 = vpop.f32.mrf.mxu1  ;;  %v4883_v45 = vsub.s32 1, %v4879_v42 }
 0x67c   : > { %v3752_v58 = vmov 0.0  }
 0x67d   : > { %v3250_v51 = vrot.slane %v3249_v39, 4  ;;  %v3260_v3 = vmax.f32 %v3259_v29, %v3257_v24  ;;  %v3177_v56 = vpop.f32.mrf.mxu1 }
 0x67f   : > { %v3251_v36 = vmax.f32 %v3249_v39, %v3250_v51  ;;  %v3261_v60 = vrot.slane %v3260_v3, 4 }
 0x681   : > { %v3252_v41 = vrot.slane %v3251_v36, 2  ;;  %v3262_v57 = vmax.f32 %v3260_v3, %v3261_v60 }
 0x683   : > { %v3253_v20 = vmax.f32 %v3251_v36, %v3252_v41  ;;  %v3263_v27 = vrot.slane %v3262_v57, 2 }
 0x685   : > { %v3254_v32 = vrot.slane %v3253_v20, 1  ;;  %v3264_v14 = vmax.f32 %v3262_v57, %v3263_v27 }
 0x687   : > { %v3255_v10 = vmax.f32 %v3253_v20, %v3254_v32  ;;  %v3265_v34 = vrot.slane %v3264_v14, 1 }
 0x689   : > { %vm3267_vm11 = vcmp.eq.f32.partialorder %v3162_v8, %v3255_v10  ;;  %vm3271_vm9 = vcmp.eq.f32.partialorder %v3172_v53, %v3255_v10  ;;  %v3266_v18 = vmax.f32 %v3264_v14, %v3265_v34  ;;  %vm3269_vm10 = vcmp.eq.f32.partialorder %v3166_v12, %v3255_v10  ;;  %v3315_v8 = vld [vmem:[%s4674_s8] sm:$0x3] }
 0x68a   : > { %v3273_v47 = vsel %vm3267_vm11, %v4879_v42, 19  ;;  %v3277_v11 = vsel %vm3271_vm9, %v4880_v35, 19  ;;  %v3275_v26 = vsel %vm3269_vm10, %v4881_v46, 19  ;;  %vm3245_vm9 = vcmp.lt.s32.totalorder %v3243_v22, %v3244_v50 }
 0x68b   : > { %v3279_v54 = vsel %vm3183_vm2, %v3277_v11, 2147483647  ;;  %vm3268_vm5 = vcmp.eq.f32.partialorder %v3164_v23, %v3266_v18  ;;  %vm3270_vm4 = vcmp.eq.f32.partialorder %v3168_v21, %v3266_v18  ;;  %vm3272_vm6 = vcmp.eq.f32.partialorder %v3174_v2, %v3266_v18 }
 0x68c   : > { %vm3280_vm3 = vcmp.lt.s32.totalorder %v3273_v47, %v3279_v54  ;;  %v3274_v30 = vsel %vm3268_vm5, %v4879_v42, 19  ;;  %v3276_v37 = vsel %vm3270_vm4, %v4881_v46, 19  ;;  %v3278_v6 = vsel %vm3272_vm6, %v4880_v35, 19 }
 0x68d   : > { %v3281_v38 = vsel %vm3280_vm3, %v3273_v47, %v3279_v54  ;;  %v3293_v52 = vsel %vm1922_vm12, %v3274_v30, 2147483647  ;;  %v3295_v48 = vsel %vm3195_vm0, %v3278_v6, 2147483647  ;;  %vm3226_vm2 = vcmp.lt.s32.totalorder %v3224_v63, %v3225_v19 }
 0x68e   : > { %vm3282_vm7 = vcmp.lt.s32.totalorder %v3281_v38, %v3275_v26  ;;  %vm3296_vm8 = vcmp.lt.s32.totalorder %v3293_v52, %v3295_v48  ;;  %v3294_v44 = vsel %vm1922_vm12, %v3276_v37, 2147483647  ;;  %v3227_v1 = vsel %vm3226_vm2, %v3224_v63, %v3225_v19 }
 0x68f   : > { %v3283_v59 = vsel %vm3282_vm7, %v3281_v38, %v3275_v26  ;;  %v3297_v7 = vsel %vm3296_vm8, %v3293_v52, %v3295_v48  ;;  %v3228_v28 = vrot.slane %v3227_v1, 1  ;;  %v4882_v53 = vsub.s32 0, %v4879_v42 }
 0x690   : > { %v3284_v43 = vrot.slane %v3283_v59, 4  ;;  %vm3298_vm1 = vcmp.lt.s32.totalorder %v3297_v7, %v3294_v44  ;;  %v3324_v25 = vrot.slane %v3315_v8, %v4883_v45  ;;  %v3246_v39 = vsel %vm3245_vm9, %v3243_v22, %v3244_v50 }
 0x691   : > { %v3299_v16 = vsel %vm3298_vm1, %v3297_v7, %v3294_v44  ;;  %vm3229_vm12 = vcmp.lt.s32.totalorder %v3227_v1, %v3228_v28  ;;  %v3320_v31 = vrot.slane %v3315_v8, %v4882_v53  ;;  %vm3330_vm3 = vcmask 253952  }
 0x692   : > { %vm3285_vm13 = vcmp.lt.s32.totalorder %v3283_v59, %v3284_v43  ;;  %v3300_v55 = vrot.slane %v3299_v16, 4  ;;  %v3230_v33 = vsel %vm3229_vm12, %v3227_v1, %v3228_v28  ;;  %vm4884_vm7 = vcmask 1040384  }
 0x693   : > { %v3286_v61 = vsel %vm3285_vm13, %v3283_v59, %v3284_v43 }
 0x694   : > { %v3287_v9 = vrot.slane %v3286_v61, 2  ;;  %vm3301_vm14 = vcmp.lt.s32.totalorder %v3299_v16, %v3300_v55 }
 0x695   : > { %v3302_v13 = vsel %vm3301_vm14, %v3299_v16, %v3300_v55 }
 0x696   : > { %v3303_v4 = vrot.slane %v3302_v13, 2  ;;  %vm3288_vm0 = vcmp.lt.s32.totalorder %v3286_v61, %v3287_v9 }
 0x697   : > { %v3289_v40 = vsel %vm3288_vm0, %v3286_v61, %v3287_v9 }
 0x698   : > { %v3290_v23 = vrot.slane %v3289_v40, 1  ;;  %vm3304_vm11 = vcmp.lt.s32.totalorder %v3302_v13, %v3303_v4 }
 0x699   : > { %v3305_v12 = vsel %vm3304_vm11, %v3302_v13, %v3303_v4 }
 0x69a   : > { %vm3291_vm10 = vcmp.lt.s32.totalorder %v3289_v40, %v3290_v23  ;;  %v3306_v21 = vrot.slane %v3305_v12, 1 }
 0x69b   : > { %v3292_v2 = vsel %vm3291_vm10, %v3289_v40, %v3290_v23 }
 0x69c   : > { %vm3307_vm5 = vcmp.lt.s32.totalorder %v3305_v12, %v3306_v21  ;;  %vm3309_vm4 = vcmp.eq.s32.totalorder %v3230_v33, %v3292_v2 }
 0x69d   : > { %v3308_v29 = vsel %vm3307_vm5, %v3305_v12, %v3306_v21  ;;  %v3606_v24 = vsel %vm3309_vm4, 1.0, %v3752_v58 }
 0x69e   : > { %vm3310_vm6 = vcmp.eq.s32.totalorder %v3246_v39, %v3308_v29  ;;  %v3327_v51 = vmul.f32 %v3606_v24, %v3320_v31 }
 0x69f   : > { %v3607_v3 = vsel %vm3310_vm6, 1.0, %v3752_v58 }
 0x6a0   : > { %v3328_v56 = vmul.f32 %v3607_v3, %v3324_v25  ;;  %v3329_v49 = vsel %vm4884_vm7, %v3327_v51, 0.0 }
 0x6a2   : > { %v3331_v62 = vsel %vm3330_vm3, %v3328_v56, 0.0 }
 0x6a3   : > { %v3332_v36 = vadd.f32 %v3331_v62, %v3329_v49 }
 0x6a5   : > { %3333 = vadd.xlane.f32.xlu1 %v3332_v36 }
 0x72e   : > { %v3334_v60 = vpop.xlane.xlu1 %3333 }
 0x72f   : > { %v3335_v0 = vrot.slane %v3334_v60, 4 }
 0x731   : > { %v3336_v17 = vadd.f32 %v3335_v0, %v3334_v60 }
 0x733   : > { %v3337_v41 = vrot.slane %v3336_v17, 2 }
 0x735   : > { %v3338_v57 = vadd.f32 %v3337_v41, %v3336_v17 }
 0x737   : > { %v3339_v20 = vrot.slane %v3338_v57, 1 }
 0x739   : > { %v3340_v27 = vadd.f32 %v3339_v20, %v3338_v57 }
 0x73b   : > { %3611 = vpush %v3340_v27 }
 0x768   : > { %3344 = sbr.rel (%p3608_p9) target bundleno = 1903 (0x76f), region = 60 }
 0x76c   : > { %s3612_s17 = spop %3611 }
 0x76d   : > { %v3753_v32 = vmov 0.0  }
 0x76e   : > { %3345 = vst [vmem:[%s3841_s20] sm:$0x1] %v3753_v32 }
 0x76f PF: > { %v3347_v63 = vstv %s3612_s17 }
 0x775   : > { %v3346_v14 = vld [vmem:[%s3841_s20] sm:$0x1] }
 0x776   : > { %v3348_v15 = vadd.f32 %v3347_v63, %v3346_v14 }
 0x778   : > { %3349 = vst [vmem:[%s3841_s20] sm:$0x1] %v3348_v15 }
 0x779 PF: > { %s19_s13 = sadd.s32 1, %s3740_s13   ;;  %s4885_s30 = smov %s3732_s11 }
 0x77a   : > { %p16_p10 = scmp.ge.s32.totalorder %s19_s13, 6   ;;  %s4886_s10 = smov %s3736_s12 }
 0x77b   : > { %s4887_s11 = smov %s4890_s14  ;;  %s4888_s12 = smov %s4894_s15 }
 0x77c   :  { %18 = sbr.rel (!%p16_p10) target bundleno = 3 (0x3), region = 109 }

</bundles_post_ra>
